<compile_context>
chip_gen: v7x
topology: tpu7x:2x2x1
jax: 0.10.0
libtpu: 0.0.40
codegen_flags: <defaults>
</compile_context>

<pallas_src>
import functools

import jax
import jax.numpy as jnp
from jax.experimental import pallas as pl
from jax.experimental.pallas import tpu as pltpu


def conv_module_kernel(x_any_ref, x_body_ref,
                       wb_ref, bb_ref, wdw_ref, bdw_ref,
                       g2_ref, b2_ref, wl_ref, bl_ref,
                       o_ref,
                       xhalo_ref, hwin_ref, sems,
                       *, kernel_size, pad, tile_t, seq_len, eps, r_tail, off0):
    D = o_ref.shape[-1]
    b = pl.program_id(0)
    t = pl.program_id(1)
    n_t = pl.num_programs(1)
    inv_d = 1.0 / D

    def _norm(v):
        # one-pass LayerNorm statistics in f32: var = E[v^2] - mu^2
        s1 = jnp.sum(v, axis=-1, keepdims=True)
        s2 = jnp.sum(v * v, axis=-1, keepdims=True)
        mu = s1 * inv_d
        var = s2 * inv_d - mu * mu
        return (v - mu) * jax.lax.rsqrt(var + eps)

    def _ln1_glu(v):
        # LN1 (affine folded into wb/bb) + bottleneck Conv1d(D,2D,1) + GLU:
        # one fused (D, 2D) bf16 matmul with f32 accumulation.
        y = jnp.dot(_norm(v).astype(jnp.bfloat16), wb_ref[...],
                    preferred_element_type=jnp.float32) + bb_ref[0]
        return y[:, :D] * jax.nn.sigmoid(y[:, D:])

    # ---- 1. kick off the two tiny halo DMAs (pad rows on each side of the tile) ----
    if pad > 0:
        l_start = jnp.maximum(t * tile_t - pad, 0)
        cp_l = pltpu.make_async_copy(x_any_ref.at[b, pl.ds(l_start, pad), :],
                                     xhalo_ref.at[pl.ds(0, pad), :], sems.at[0])
        cp_l.start()

        r_start = jnp.minimum((t + 1) * tile_t, seq_len - pad)

        def _start_right(dst_off):
            pltpu.make_async_copy(x_any_ref.at[b, pl.ds(r_start, pad), :],
                                  xhalo_ref.at[pl.ds(dst_off, pad), :],
                                  sems.at[1]).start()

        if 0 < r_tail < pad:
            # 0 < (T mod tile_t) < pad: the 2nd-to-last tile's right halo straddles T;
            # its clamped source needs a shifted destination to stay position-correct.
            @pl.when(t == n_t - 2)
            def _():
                _start_right(pad + r_tail)

            @pl.when(t != n_t - 2)
            def _():
                _start_right(2 * pad)
        else:
            _start_right(2 * pad)

    # ---- 2. LN1 + GLU on the tile body (the halo DMAs overlap with this matmul) ----
    hb = _ln1_glu(x_body_ref[0].astype(jnp.float32))             # (tile_t, D) f32

    # ---- 3. LN1 + GLU on the (tiny) halo rows ----
    if pad > 0:
        cp_l.wait()
        pltpu.make_async_copy(x_any_ref.at[b, pl.ds(r_start, pad), :],
                              xhalo_ref.at[pl.ds(2 * pad, pad), :], sems.at[1]).wait()
        hh = _ln1_glu(xhalo_ref[...].astype(jnp.float32))        # (halo_rows, D)
        hl = hh[0:pad, :]
        hr = hh[2 * pad:3 * pad, :]

    # ---- 4. assemble the h window; only boundary tiles pay the zero-padding mask ----
    needs_mask = jnp.logical_or(t == 0, (t + 1) * tile_t + pad > seq_len)

    @pl.when(needs_mask)
    def _():
        pos_b = t * tile_t + jax.lax.broadcasted_iota(jnp.int32, (tile_t, 1), 0)
        hwin_ref[off0:off0 + tile_t, :] = jnp.where(pos_b < seq_len, hb, 0.0)
        if pad > 0:
            pos_l = t * tile_t - pad + jax.lax.broadcasted_iota(jnp.int32, (pad, 1), 0)
            hwin_ref[off0 - pad:off0, :] = jnp.where(pos_l >= 0, hl, 0.0)
            pos_r = (t + 1) * tile_t + jax.lax.broadcasted_iota(jnp.int32, (pad, 1), 0)
            hwin_ref[off0 + tile_t:off0 + tile_t + pad, :] = jnp.where(pos_r < seq_len, hr, 0.0)

    @pl.when(jnp.logical_not(needs_mask))
    def _():
        hwin_ref[off0:off0 + tile_t, :] = hb
        if pad > 0:
            hwin_ref[off0 - pad:off0, :] = hl
            hwin_ref[off0 + tile_t:off0 + tile_t + pad, :] = hr

    # ---- 5. depthwise Conv1d(D, D, K, groups=D): K shifted MACs over the window ----
    # TODO(synk): on v6e/v7x a bf16 hwin + pltpu.roll taps would cut VMEM slot pressure.
    acc = jnp.zeros((tile_t, D), jnp.float32) + bdw_ref[0]
    for k in range(kernel_size):                                 # small static unroll
        acc = acc + hwin_ref[off0 - pad + k:off0 - pad + k + tile_t, :] * wdw_ref[k]

    # ---- 6. LayerNorm #2 + Swish + Linear (dropout == identity at inference) ----
    zn = _norm(acc) * g2_ref[0] + b2_ref[0]
    s = zn * jax.nn.sigmoid(zn)                                  # Swish (beta=1)
    out = jnp.dot(s.astype(jnp.bfloat16), wl_ref[...],
                  preferred_element_type=jnp.float32) + bl_ref[0]
    o_ref[0] = out.astype(o_ref.dtype)


def conformer_conv_module(x, kparams, *, kernel_size, tile_t=None, eps=1e-5):
    B, T, D = x.shape
    if kernel_size % 2 != 1:
        raise ValueError("only odd kernel_size matches the PyTorch same-length output")
    pad = (kernel_size - 1) // 2               # non-causal, dilation=1
    if T < kernel_size:
        # TODO(synk): sequences shorter than the conv kernel would need a host pad path.
        raise NotImplementedError("T < kernel_size not supported")

    if tile_t is None:
        tile_t = 512 if T >= 512 else T
    tile_t = min(tile_t, T)
    if tile_t != T and tile_t % 8 != 0:
        raise ValueError("tile_t must be a multiple of 8 (or the full sequence length)")
    if tile_t < kernel_size:
        raise ValueError("tile_t must be >= kernel_size")

    n_t = pl.cdiv(T, tile_t)
    r_tail = T % tile_t
    off0 = ((pad + 7) // 8) * 8 if pad > 0 else 0    # 8-aligned start of body rows in hwin
    halo_rows = ((3 * pad + 7) // 8) * 8 if pad > 0 else 8
    hwin_rows = off0 + tile_t + pad

    kernel = functools.partial(conv_module_kernel, kernel_size=kernel_size, pad=pad,
                               tile_t=tile_t, seq_len=T, eps=eps, r_tail=r_tail, off0=off0)

    def const(shape):
        return pl.BlockSpec(shape, lambda b, t: (0,) * len(shape))

    in_specs = [
        pl.BlockSpec(memory_space=pl.ANY),                      # x (raw HBM) for halo DMAs
        pl.BlockSpec((1, tile_t, D), lambda b, t: (b, t, 0)),   # x body tile (auto-pipelined)
        const((D, 2 * D)), const((1, 2 * D)),                   # fused LN1+bottleneck W (bf16) / bias
        const((kernel_size, D)), const((1, D)),                 # depthwise conv W / bias
        const((1, D)), const((1, D)),                           # ln2 gamma / beta
        const((D, D)), const((1, D)),                           # output linear W (bf16) / bias
    ]

    # VMEM budget from actual buffer sizes (double-buffered blocks/weights + scratch +
    # f32 temporaries), capped at 64 MiB so the same config stays valid on v7x.
    blk = tile_t * D * x.dtype.itemsize
    w_bytes = sum(int(a.size) * a.dtype.itemsize for a in kparams)
    scratch = hwin_rows * D * 4 + halo_rows * D * x.dtype.itemsize
    est = 4 * blk + 2 * w_bytes + scratch + 10 * tile_t * D * 4
    vmem_limit = int(min(64 * 2 ** 20, max(32 * 2 ** 20, 2 * est)))

    flops = 6 * B * T * D * D + 2 * B * T * D * kernel_size
    transcendentals = 2 * B * T * D + 2 * B * T
    bytes_accessed = int(2 * B * T * D * x.dtype.itemsize + w_bytes)
    cost = pl.CostEstimate(flops=flops, transcendentals=transcendentals,
                           bytes_accessed=bytes_accessed)

    return pl.pallas_call(
        kernel,
        out_shape=jax.ShapeDtypeStruct((B, T, D), x.dtype),
        grid_spec=pltpu.PrefetchScalarGridSpec(
            num_scalar_prefetch=0,
            grid=(B, n_t),
            in_specs=in_specs,
            out_specs=pl.BlockSpec((1, tile_t, D), lambda b, t: (b, t, 0)),
            scratch_shapes=[
                pltpu.VMEM((halo_rows, D), x.dtype),        # halo rows: [left | slack | right]
                pltpu.VMEM((hwin_rows, D), jnp.float32),    # post-GLU h window (8-aligned body)
                pltpu.SemaphoreType.DMA((2,)),
            ]),
        compiler_params=pltpu.CompilerParams(
            dimension_semantics=("parallel", "parallel"),
            vmem_limit_bytes=vmem_limit),
        cost_estimate=cost,
    )(x, x, *kparams)


def init_params(key, D, K):
    """Deterministic synthetic params with the same shapes PyTorch __init__ creates."""
    ks = jax.random.split(key, 10)
    s = 0.05
    return {
        "g1": 1.0 + s * jax.random.normal(ks[0], (D,), jnp.float32),
        "b1": s * jax.random.normal(ks[1], (D,), jnp.float32),
        "wb": s * jax.random.normal(ks[2], (2 * D, D), jnp.float32),   # Conv1d(D,2D,1).weight squeezed
        "bb": s * jax.random.normal(ks[3], (2 * D,), jnp.float32),
        "wdw": 0.2 * jax.random.normal(ks[4], (D, K), jnp.float32),    # Conv1d(D,D,K,groups=D).weight squeezed
        "bdw": s * jax.random.normal(ks[5], (D,), jnp.float32),
        "g2": 1.0 + s * jax.random.normal(ks[6], (D,), jnp.float32),
        "b2": s * jax.random.normal(ks[7], (D,), jnp.float32),
        "wl": s * jax.random.normal(ks[8], (D, D), jnp.float32),       # Linear(D,D).weight (out,in)
        "bl": s * jax.random.normal(ks[9], (D,), jnp.float32),
    }


def pack_kernel_params(p, D):
    """Reshape / transpose / cast PyTorch-style params; folds LN1 gamma/beta into wb/bb."""
    wbT = p["wb"].T                                  # (D, 2D)
    wb_fold = p["g1"][:, None] * wbT                 # diag(g1) @ wb
    bb_fold = p["bb"] + p["b1"] @ wbT                # bb + b1 @ wb
    return (
        wb_fold.astype(jnp.bfloat16),                # cols [:D] = GLU value, [D:] = gate
        bb_fold.reshape(1, 2 * D).astype(jnp.float32),
        p["wdw"].T, p["bdw"].reshape(1, D),          # (K, D)
        p["g2"].reshape(1, D), p["b2"].reshape(1, D),
        p["wl"].T.astype(jnp.bfloat16),              # (D_in, D_out)
        p["bl"].reshape(1, D),
    )


def reference(x, p, K, eps=1e-5):
    """Pure-JAX f32 reference matching the PyTorch forward semantics."""
    B, T, D = x.shape
    pad = (K - 1) // 2
    hi = jax.lax.Precision.HIGHEST
    mu = x.mean(-1, keepdims=True)
    var = ((x - mu) ** 2).mean(-1, keepdims=True)
    xn = (x - mu) / jnp.sqrt(var + eps) * p["g1"] + p["b1"]
    y = jnp.einsum("btd,ed->bte", xn, p["wb"], precision=hi) + p["bb"]   # (B,T,2D)
    h = y[..., :D] * jax.nn.sigmoid(y[..., D:])                          # GLU
    hp = jnp.pad(h, ((0, 0), (pad, pad), (0, 0)))
    acc = jnp.zeros_like(h)
    for k in range(K):
        acc = acc + hp[:, k:k + T, :] * p["wdw"][:, k]
    acc = acc + p["bdw"]
    mu2 = acc.mean(-1, keepdims=True)
    var2 = ((acc - mu2) ** 2).mean(-1, keepdims=True)
    zn = (acc - mu2) / jnp.sqrt(var2 + eps) * p["g2"] + p["b2"]
    s = zn * jax.nn.sigmoid(zn)
    return jnp.einsum("btd,ed->bte", s, p["wl"], precision=hi) + p["bl"]


if __name__ == "__main__":
    def run_case(B, T, D, K, tile_t, key):
        kx, kp = jax.random.split(key)
        x = jax.random.normal(kx, (B, T, D), jnp.float32)
        params = init_params(kp, D, K)
        out = conformer_conv_module(x, pack_kernel_params(params, D),
                                    kernel_size=K, tile_t=tile_t)
        out = jax.block_until_ready(out)
        ref = reference(x, params, K)
        assert out.shape == (B, T, D)
        err = float(jnp.max(jnp.abs(out - ref)))
        # bf16 MXU inputs (f32 accumulation) vs a pure-f32 reference.
        assert err < 5e-2, (B, T, D, K, tile_t, err)

    key = jax.random.PRNGKey(0)
    k1, k2 = jax.random.split(key)
    # Main case: D multiple of 128 (lane-dense), multi-tile grid with a ragged
    # (masked) last time tile; T is NOT a multiple of tile_t on purpose.
    run_case(B=2, T=56, D=128, K=7, tile_t=32, key=k1)
    # Edge case: 0 < T % tile_t < pad exercises the shifted right-halo DMA branch.
    run_case(B=2, T=66, D=128, K=7, tile_t=32, key=k2)
    print("KERNEL_OK")
</pallas_src>

<mosaic_0001>
module attributes {stable_mosaic.version = 11 : i64} {
  func.func @conv_module_kernel(%arg0: i32, %arg1: i32, %arg2: memref<2x56x128xf32, #tpu.memory_space<any>>, %arg3: memref<1x32x128xf32, #tpu.memory_space<vmem>>, %arg4: memref<128x256xbf16, #tpu.memory_space<vmem>>, %arg5: memref<1x256xf32, #tpu.memory_space<vmem>>, %arg6: memref<7x128xf32, #tpu.memory_space<vmem>>, %arg7: memref<1x128xf32, #tpu.memory_space<vmem>>, %arg8: memref<1x128xf32, #tpu.memory_space<vmem>>, %arg9: memref<1x128xf32, #tpu.memory_space<vmem>>, %arg10: memref<128x128xbf16, #tpu.memory_space<vmem>>, %arg11: memref<1x128xf32, #tpu.memory_space<vmem>>, %arg12: memref<1x32x128xf32, #tpu.memory_space<vmem>>, %arg13: memref<16x128xf32, #tpu.memory_space<vmem>>, %arg14: memref<43x128xf32, #tpu.memory_space<vmem>>, %arg15: memref<2x!tpu.dma_semaphore, #tpu.memory_space<semaphore_mem>>) attributes {dimension_semantics = [#tpu.dimension_semantics<parallel>, #tpu.dimension_semantics<parallel>], iteration_bounds = array<i64: 2, 2>, scalar_prefetch = 0 : i64, scratch_operands = 3 : i64, tpu.core_type = #tpu.core_type<tc>, window_params = [{}, {transform_indices = @transform_1, window_bounds = array<i64: 1, 32, 128>}, {pipeline_mode = #tpu.pipeline_mode<synchronous>, transform_indices = @transform_2, window_bounds = array<i64: 128, 256>}, {pipeline_mode = #tpu.pipeline_mode<synchronous>, transform_indices = @transform_3, window_bounds = array<i64: 1, 256>}, {pipeline_mode = #tpu.pipeline_mode<synchronous>, transform_indices = @transform_4, window_bounds = array<i64: 7, 128>}, {pipeline_mode = #tpu.pipeline_mode<synchronous>, transform_indices = @transform_5, window_bounds = array<i64: 1, 128>}, {pipeline_mode = #tpu.pipeline_mode<synchronous>, transform_indices = @transform_6, window_bounds = array<i64: 1, 128>}, {pipeline_mode = #tpu.pipeline_mode<synchronous>, transform_indices = @transform_7, window_bounds = array<i64: 1, 128>}, {pipeline_mode = #tpu.pipeline_mode<synchronous>, transform_indices = @transform_8, window_bounds = array<i64: 128, 128>}, {pipeline_mode = #tpu.pipeline_mode<synchronous>, transform_indices = @transform_9, window_bounds = array<i64: 1, 128>}, {transform_indices = @transform_10, window_bounds = array<i64: 1, 32, 128>}]} {
    %c32_i32 = arith.constant 32 : i32
    %0 = arith.muli %arg1, %c32_i32 : i32
    %c3_i32 = arith.constant 3 : i32
    %1 = arith.subi %0, %c3_i32 : i32
    %c0_i32 = arith.constant 0 : i32
    %2 = arith.maxsi %1, %c0_i32 : i32
    %c0_i32_0 = arith.constant 0 : i32
    %c0_i32_1 = arith.constant 0 : i32
    %3 = tpu.memref_slice %arg2[%arg0, %2, %c0_i32_1] : memref<2x56x128xf32, #tpu.memory_space<any>> -> memref<1x3x128xf32, #tpu.memory_space<any>>
    %4 = tpu.memref_squeeze %3 : memref<1x3x128xf32, #tpu.memory_space<any>> -> memref<3x128xf32, #tpu.memory_space<any>>
    %c0_i32_2 = arith.constant 0 : i32
    %c0_i32_3 = arith.constant 0 : i32
    %5 = tpu.memref_slice %arg13[%c0_i32_2, %c0_i32_3] : memref<16x128xf32, #tpu.memory_space<vmem>> -> memref<3x128xf32, #tpu.memory_space<vmem>>
    %6 = tpu.memref_slice %arg15[%c0_i32_0] : memref<2x!tpu.dma_semaphore, #tpu.memory_space<semaphore_mem>> -> memref<1x!tpu.dma_semaphore, #tpu.memory_space<semaphore_mem>>
    %7 = tpu.memref_squeeze %6 : memref<1x!tpu.dma_semaphore, #tpu.memory_space<semaphore_mem>> -> memref<!tpu.dma_semaphore, #tpu.memory_space<semaphore_mem>>
    tpu.enqueue_dma source(%4 : memref<3x128xf32, #tpu.memory_space<any>>) target(%5 : memref<3x128xf32, #tpu.memory_space<vmem>>) target_semaphore(%7 : memref<!tpu.dma_semaphore, #tpu.memory_space<semaphore_mem>>)
    %c1_i32 = arith.constant 1 : i32
    %8 = arith.addi %arg1, %c1_i32 : i32
    %c32_i32_4 = arith.constant 32 : i32
    %9 = arith.muli %8, %c32_i32_4 : i32
    %c53_i32 = arith.constant 53 : i32
    %10 = arith.minsi %9, %c53_i32 : i32
    %c1_i32_5 = arith.constant 1 : i32
    %c0_i32_6 = arith.constant 0 : i32
    %11 = tpu.memref_slice %arg2[%arg0, %10, %c0_i32_6] : memref<2x56x128xf32, #tpu.memory_space<any>> -> memref<1x3x128xf32, #tpu.memory_space<any>>
    %12 = tpu.memref_squeeze %11 : memref<1x3x128xf32, #tpu.memory_space<any>> -> memref<3x128xf32, #tpu.memory_space<any>>
    %c6_i32 = arith.constant 6 : i32
    %c0_i32_7 = arith.constant 0 : i32
    %13 = tpu.memref_slice %arg13[%c6_i32, %c0_i32_7] : memref<16x128xf32, #tpu.memory_space<vmem>> -> memref<3x128xf32, #tpu.memory_space<vmem>>
    %14 = tpu.memref_slice %arg15[%c1_i32_5] : memref<2x!tpu.dma_semaphore, #tpu.memory_space<semaphore_mem>> -> memref<1x!tpu.dma_semaphore, #tpu.memory_space<semaphore_mem>>
    %15 = tpu.memref_squeeze %14 : memref<1x!tpu.dma_semaphore, #tpu.memory_space<semaphore_mem>> -> memref<!tpu.dma_semaphore, #tpu.memory_space<semaphore_mem>>
    tpu.enqueue_dma source(%12 : memref<3x128xf32, #tpu.memory_space<any>>) target(%13 : memref<3x128xf32, #tpu.memory_space<vmem>>) target_semaphore(%15 : memref<!tpu.dma_semaphore, #tpu.memory_space<semaphore_mem>>)
    %c0 = arith.constant 0 : index
    %c0_8 = arith.constant 0 : index
    %c0_9 = arith.constant 0 : index
    %16 = vector.load %arg3[%c0, %c0_8, %c0_9] : memref<1x32x128xf32, #tpu.memory_space<vmem>>, vector<1x32x128xf32>
    %17 = vector.shape_cast %16 : vector<1x32x128xf32> to vector<32x128xf32>
    %cst = arith.constant dense<0.000000e+00> : vector<32xf32>
    %18 = vector.multi_reduction <add>, %17, %cst [1] : vector<32x128xf32> to vector<32xf32>
    %19 = vector.shape_cast %18 : vector<32xf32> to vector<32x1xf32>
    %20 = arith.mulf %17, %17 : vector<32x128xf32>
    %cst_10 = arith.constant dense<0.000000e+00> : vector<32xf32>
    %21 = vector.multi_reduction <add>, %20, %cst_10 [1] : vector<32x128xf32> to vector<32xf32>
    %22 = vector.shape_cast %21 : vector<32xf32> to vector<32x1xf32>
    %cst_11 = arith.constant 7.812500e-03 : f32
    %23 = vector.broadcast %cst_11 : f32 to vector<32x1xf32>
    %24 = arith.mulf %19, %23 : vector<32x1xf32>
    %cst_12 = arith.constant 7.812500e-03 : f32
    %25 = vector.broadcast %cst_12 : f32 to vector<32x1xf32>
    %26 = arith.mulf %22, %25 : vector<32x1xf32>
    %27 = arith.mulf %24, %24 : vector<32x1xf32>
    %28 = arith.subf %26, %27 : vector<32x1xf32>
    %29 = vector.broadcast %24 : vector<32x1xf32> to vector<32x128xf32>
    %30 = arith.subf %17, %29 : vector<32x128xf32>
    %cst_13 = arith.constant 9.99999974E-6 : f32
    %31 = vector.broadcast %cst_13 : f32 to vector<32x1xf32>
    %32 = arith.addf %28, %31 : vector<32x1xf32>
    %33 = math.rsqrt %32 : vector<32x1xf32>
    %34 = vector.broadcast %33 : vector<32x1xf32> to vector<32x128xf32>
    %35 = arith.mulf %30, %34 : vector<32x128xf32>
    %36 = arith.truncf %35 : vector<32x128xf32> to vector<32x128xbf16>
    %c0_14 = arith.constant 0 : index
    %c0_15 = arith.constant 0 : index
    %37 = vector.load %arg4[%c0_14, %c0_15] : memref<128x256xbf16, #tpu.memory_space<vmem>>, vector<128x256xbf16>
    %cst_16 = arith.constant dense<0.000000e+00> : vector<32x256xf32>
    %38 = tpu.matmul %36, %37, %cst_16 {dimension_numbers = #tpu.dot_dimension_numbers<[1], [0], [0], [1], [0, 0, 1, 1], [], []>} : vector<32x128xbf16>, vector<128x256xbf16>, vector<32x256xf32> -> vector<32x256xf32>
    %c0_17 = arith.constant 0 : index
    %c0_18 = arith.constant 0 : index
    %39 = vector.load %arg5[%c0_17, %c0_18] : memref<1x256xf32, #tpu.memory_space<vmem>>, vector<1x256xf32>
    %40 = vector.shape_cast %39 : vector<1x256xf32> to vector<256xf32>
    %41 = vector.shape_cast %40 : vector<256xf32> to vector<1x256xf32>
    %42 = vector.broadcast %41 : vector<1x256xf32> to vector<32x256xf32>
    %43 = arith.addf %38, %42 : vector<32x256xf32>
    %44 = vector.extract_strided_slice %43 {offsets = [0, 0], sizes = [32, 128], strides = [1, 1]} : vector<32x256xf32> to vector<32x128xf32>
    %45 = vector.extract_strided_slice %43 {offsets = [0, 128], sizes = [32, 128], strides = [1, 1]} : vector<32x256xf32> to vector<32x128xf32>
    %46 = arith.negf %45 : vector<32x128xf32>
    %47 = math.exp %46 : vector<32x128xf32>
    %cst_19 = arith.constant 1.000000e+00 : f32
    %48 = vector.broadcast %cst_19 : f32 to vector<32x128xf32>
    %49 = arith.addf %48, %47 : vector<32x128xf32>
    %50 = arith.divf %48, %49 : vector<32x128xf32>
    %51 = arith.mulf %44, %50 : vector<32x128xf32>
    %c0_i32_20 = arith.constant 0 : i32
    %c0_i32_21 = arith.constant 0 : i32
    %52 = tpu.memref_slice %arg2[%arg0, %2, %c0_i32_21] : memref<2x56x128xf32, #tpu.memory_space<any>> -> memref<1x3x128xf32, #tpu.memory_space<any>>
    %53 = tpu.memref_squeeze %52 : memref<1x3x128xf32, #tpu.memory_space<any>> -> memref<3x128xf32, #tpu.memory_space<any>>
    %c0_i32_22 = arith.constant 0 : i32
    %c0_i32_23 = arith.constant 0 : i32
    %54 = tpu.memref_slice %arg13[%c0_i32_22, %c0_i32_23] : memref<16x128xf32, #tpu.memory_space<vmem>> -> memref<3x128xf32, #tpu.memory_space<vmem>>
    %55 = tpu.memref_slice %arg15[%c0_i32_20] : memref<2x!tpu.dma_semaphore, #tpu.memory_space<semaphore_mem>> -> memref<1x!tpu.dma_semaphore, #tpu.memory_space<semaphore_mem>>
    %56 = tpu.memref_squeeze %55 : memref<1x!tpu.dma_semaphore, #tpu.memory_space<semaphore_mem>> -> memref<!tpu.dma_semaphore, #tpu.memory_space<semaphore_mem>>
    tpu.wait_dma2 semaphore(%56 : memref<!tpu.dma_semaphore, #tpu.memory_space<semaphore_mem>>) src(%53 : memref<3x128xf32, #tpu.memory_space<any>>) dst(%54 : memref<3x128xf32, #tpu.memory_space<vmem>>)
    %c1_i32_24 = arith.constant 1 : i32
    %c0_i32_25 = arith.constant 0 : i32
    %57 = tpu.memref_slice %arg2[%arg0, %10, %c0_i32_25] : memref<2x56x128xf32, #tpu.memory_space<any>> -> memref<1x3x128xf32, #tpu.memory_space<any>>
    %58 = tpu.memref_squeeze %57 : memref<1x3x128xf32, #tpu.memory_space<any>> -> memref<3x128xf32, #tpu.memory_space<any>>
    %c6_i32_26 = arith.constant 6 : i32
    %c0_i32_27 = arith.constant 0 : i32
    %59 = tpu.memref_slice %arg13[%c6_i32_26, %c0_i32_27] : memref<16x128xf32, #tpu.memory_space<vmem>> -> memref<3x128xf32, #tpu.memory_space<vmem>>
    %60 = tpu.memref_slice %arg15[%c1_i32_24] : memref<2x!tpu.dma_semaphore, #tpu.memory_space<semaphore_mem>> -> memref<1x!tpu.dma_semaphore, #tpu.memory_space<semaphore_mem>>
    %61 = tpu.memref_squeeze %60 : memref<1x!tpu.dma_semaphore, #tpu.memory_space<semaphore_mem>> -> memref<!tpu.dma_semaphore, #tpu.memory_space<semaphore_mem>>
    tpu.wait_dma2 semaphore(%61 : memref<!tpu.dma_semaphore, #tpu.memory_space<semaphore_mem>>) src(%58 : memref<3x128xf32, #tpu.memory_space<any>>) dst(%59 : memref<3x128xf32, #tpu.memory_space<vmem>>)
    %c0_28 = arith.constant 0 : index
    %c0_29 = arith.constant 0 : index
    %62 = vector.load %arg13[%c0_28, %c0_29] : memref<16x128xf32, #tpu.memory_space<vmem>>, vector<16x128xf32>
    %cst_30 = arith.constant dense<0.000000e+00> : vector<16xf32>
    %63 = vector.multi_reduction <add>, %62, %cst_30 [1] : vector<16x128xf32> to vector<16xf32>
    %64 = vector.shape_cast %63 : vector<16xf32> to vector<16x1xf32>
    %65 = arith.mulf %62, %62 : vector<16x128xf32>
    %cst_31 = arith.constant dense<0.000000e+00> : vector<16xf32>
    %66 = vector.multi_reduction <add>, %65, %cst_31 [1] : vector<16x128xf32> to vector<16xf32>
    %67 = vector.shape_cast %66 : vector<16xf32> to vector<16x1xf32>
    %cst_32 = arith.constant 7.812500e-03 : f32
    %68 = vector.broadcast %cst_32 : f32 to vector<16x1xf32>
    %69 = arith.mulf %64, %68 : vector<16x1xf32>
    %cst_33 = arith.constant 7.812500e-03 : f32
    %70 = vector.broadcast %cst_33 : f32 to vector<16x1xf32>
    %71 = arith.mulf %67, %70 : vector<16x1xf32>
    %72 = arith.mulf %69, %69 : vector<16x1xf32>
    %73 = arith.subf %71, %72 : vector<16x1xf32>
    %74 = vector.broadcast %69 : vector<16x1xf32> to vector<16x128xf32>
    %75 = arith.subf %62, %74 : vector<16x128xf32>
    %cst_34 = arith.constant 9.99999974E-6 : f32
    %76 = vector.broadcast %cst_34 : f32 to vector<16x1xf32>
    %77 = arith.addf %73, %76 : vector<16x1xf32>
    %78 = math.rsqrt %77 : vector<16x1xf32>
    %79 = vector.broadcast %78 : vector<16x1xf32> to vector<16x128xf32>
    %80 = arith.mulf %75, %79 : vector<16x128xf32>
    %81 = arith.truncf %80 : vector<16x128xf32> to vector<16x128xbf16>
    %c0_35 = arith.constant 0 : index
    %c0_36 = arith.constant 0 : index
    %82 = vector.load %arg4[%c0_35, %c0_36] : memref<128x256xbf16, #tpu.memory_space<vmem>>, vector<128x256xbf16>
    %cst_37 = arith.constant dense<0.000000e+00> : vector<16x256xf32>
    %83 = tpu.matmul %81, %82, %cst_37 {dimension_numbers = #tpu.dot_dimension_numbers<[1], [0], [0], [1], [0, 0, 1, 1], [], []>} : vector<16x128xbf16>, vector<128x256xbf16>, vector<16x256xf32> -> vector<16x256xf32>
    %c0_38 = arith.constant 0 : index
    %c0_39 = arith.constant 0 : index
    %84 = vector.load %arg5[%c0_38, %c0_39] : memref<1x256xf32, #tpu.memory_space<vmem>>, vector<1x256xf32>
    %85 = vector.shape_cast %84 : vector<1x256xf32> to vector<256xf32>
    %86 = vector.shape_cast %85 : vector<256xf32> to vector<1x256xf32>
    %87 = vector.broadcast %86 : vector<1x256xf32> to vector<16x256xf32>
    %88 = arith.addf %83, %87 : vector<16x256xf32>
    %89 = vector.extract_strided_slice %88 {offsets = [0, 0], sizes = [16, 128], strides = [1, 1]} : vector<16x256xf32> to vector<16x128xf32>
    %90 = vector.extract_strided_slice %88 {offsets = [0, 128], sizes = [16, 128], strides = [1, 1]} : vector<16x256xf32> to vector<16x128xf32>
    %91 = arith.negf %90 : vector<16x128xf32>
    %92 = math.exp %91 : vector<16x128xf32>
    %cst_40 = arith.constant 1.000000e+00 : f32
    %93 = vector.broadcast %cst_40 : f32 to vector<16x128xf32>
    %94 = arith.addf %93, %92 : vector<16x128xf32>
    %95 = arith.divf %93, %94 : vector<16x128xf32>
    %96 = arith.mulf %89, %95 : vector<16x128xf32>
    %97 = vector.extract_strided_slice %96 {offsets = [0, 0], sizes = [3, 128], strides = [1, 1]} : vector<16x128xf32> to vector<3x128xf32>
    %98 = vector.extract_strided_slice %96 {offsets = [6, 0], sizes = [3, 128], strides = [1, 1]} : vector<16x128xf32> to vector<3x128xf32>
    %c0_i32_41 = arith.constant 0 : i32
    %99 = arith.cmpi eq, %arg1, %c0_i32_41 : i32
    %c1_i32_42 = arith.constant 1 : i32
    %100 = arith.addi %arg1, %c1_i32_42 : i32
    %c32_i32_43 = arith.constant 32 : i32
    %101 = arith.muli %100, %c32_i32_43 : i32
    %c3_i32_44 = arith.constant 3 : i32
    %102 = arith.addi %101, %c3_i32_44 : i32
    %c56_i32 = arith.constant 56 : i32
    %103 = arith.cmpi sgt, %102, %c56_i32 : i32
    %104 = arith.ori %99, %103 : i1
    %105 = arith.extui %104 : i1 to i32
    %c0_i32_45 = arith.constant 0 : i32
    %106 = arith.cmpi ne, %105, %c0_i32_45 : i32
    scf.if %106 {
      %c32_i32_85 = arith.constant 32 : i32
      %210 = arith.muli %arg1, %c32_i32_85 : i32
      %211 = tpu.iota {dimensions = array<i32: 0>} : vector<32x1xi32>
      %212 = vector.broadcast %210 : i32 to vector<32x1xi32>
      %213 = arith.addi %212, %211 : vector<32x1xi32>
      %c56_i32_86 = arith.constant 56 : i32
      %214 = vector.broadcast %c56_i32_86 : i32 to vector<32x1xi32>
      %215 = arith.cmpi slt, %213, %214 : vector<32x1xi32>
      %cst_87 = arith.constant 0.000000e+00 : f32
      %216 = vector.shape_cast %215 : vector<32x1xi1> to vector<32x1xi1>
      %217 = vector.broadcast %216 : vector<32x1xi1> to vector<32x128xi1>
      %218 = vector.broadcast %cst_87 : f32 to vector<32x128xf32>
      %219 = arith.select %217, %51, %218 : vector<32x128xi1>, vector<32x128xf32>
      %c8_88 = arith.constant 8 : index
      %c0_89 = arith.constant 0 : index
      %220 = vector.load %arg14[%c8_88, %c0_89] : memref<43x128xf32, #tpu.memory_space<vmem>>, vector<32x128xf32>
      tpu.vector_store %arg14[%c8_88, %c0_89], %219 {strides = array<i32>} : memref<43x128xf32, #tpu.memory_space<vmem>>, vector<32x128xf32>,
      %c32_i32_90 = arith.constant 32 : i32
      %221 = arith.muli %arg1, %c32_i32_90 : i32
      %c3_i32_91 = arith.constant 3 : i32
      %222 = arith.subi %221, %c3_i32_91 : i32
      %223 = tpu.iota {dimensions = array<i32: 0>} : vector<3x1xi32>
      %224 = vector.broadcast %222 : i32 to vector<3x1xi32>
      %225 = arith.addi %224, %223 : vector<3x1xi32>
      %c0_i32_92 = arith.constant 0 : i32
      %226 = vector.broadcast %c0_i32_92 : i32 to vector<3x1xi32>
      %227 = arith.cmpi sge, %225, %226 : vector<3x1xi32>
      %cst_93 = arith.constant 0.000000e+00 : f32
      %228 = vector.shape_cast %227 : vector<3x1xi1> to vector<3x1xi1>
      %229 = vector.broadcast %228 : vector<3x1xi1> to vector<3x128xi1>
      %230 = vector.broadcast %cst_93 : f32 to vector<3x128xf32>
      %231 = arith.select %229, %97, %230 : vector<3x128xi1>, vector<3x128xf32>
      %c5_94 = arith.constant 5 : index
      %c0_95 = arith.constant 0 : index
      %232 = vector.load %arg14[%c5_94, %c0_95] : memref<43x128xf32, #tpu.memory_space<vmem>>, vector<3x128xf32>
      tpu.vector_store %arg14[%c5_94, %c0_95], %231 {strides = array<i32>} : memref<43x128xf32, #tpu.memory_space<vmem>>, vector<3x128xf32>,
      %c1_i32_96 = arith.constant 1 : i32
      %233 = arith.addi %arg1, %c1_i32_96 : i32
      %c32_i32_97 = arith.constant 32 : i32
      %234 = arith.muli %233, %c32_i32_97 : i32
      %235 = tpu.iota {dimensions = array<i32: 0>} : vector<3x1xi32>
      %236 = vector.broadcast %234 : i32 to vector<3x1xi32>
      %237 = arith.addi %236, %235 : vector<3x1xi32>
      %c56_i32_98 = arith.constant 56 : i32
      %238 = vector.broadcast %c56_i32_98 : i32 to vector<3x1xi32>
      %239 = arith.cmpi slt, %237, %238 : vector<3x1xi32>
      %cst_99 = arith.constant 0.000000e+00 : f32
      %240 = vector.shape_cast %239 : vector<3x1xi1> to vector<3x1xi1>
      %241 = vector.broadcast %240 : vector<3x1xi1> to vector<3x128xi1>
      %242 = vector.broadcast %cst_99 : f32 to vector<3x128xf32>
      %243 = arith.select %241, %98, %242 : vector<3x128xi1>, vector<3x128xf32>
      %c40 = arith.constant 40 : index
      %c0_100 = arith.constant 0 : index
      %244 = vector.load %arg14[%c40, %c0_100] : memref<43x128xf32, #tpu.memory_space<vmem>>, vector<3x128xf32>
      tpu.vector_store %arg14[%c40, %c0_100], %243 {strides = array<i32>} : memref<43x128xf32, #tpu.memory_space<vmem>>, vector<3x128xf32>,
    } else {
    }
    %true = arith.constant true
    %107 = arith.xori %104, %true : i1
    %108 = arith.extui %107 : i1 to i32
    %c0_i32_46 = arith.constant 0 : i32
    %109 = arith.cmpi ne, %108, %c0_i32_46 : i32
    scf.if %109 {
      %c8_85 = arith.constant 8 : index
      %c0_86 = arith.constant 0 : index
      %210 = vector.load %arg14[%c8_85, %c0_86] : memref<43x128xf32, #tpu.memory_space<vmem>>, vector<32x128xf32>
      tpu.vector_store %arg14[%c8_85, %c0_86], %51 {strides = array<i32>} : memref<43x128xf32, #tpu.memory_space<vmem>>, vector<32x128xf32>,
      %c5_87 = arith.constant 5 : index
      %c0_88 = arith.constant 0 : index
      %211 = vector.load %arg14[%c5_87, %c0_88] : memref<43x128xf32, #tpu.memory_space<vmem>>, vector<3x128xf32>
      tpu.vector_store %arg14[%c5_87, %c0_88], %97 {strides = array<i32>} : memref<43x128xf32, #tpu.memory_space<vmem>>, vector<3x128xf32>,
      %c40 = arith.constant 40 : index
      %c0_89 = arith.constant 0 : index
      %212 = vector.load %arg14[%c40, %c0_89] : memref<43x128xf32, #tpu.memory_space<vmem>>, vector<3x128xf32>
      tpu.vector_store %arg14[%c40, %c0_89], %98 {strides = array<i32>} : memref<43x128xf32, #tpu.memory_space<vmem>>, vector<3x128xf32>,
    } else {
    }
    %cst_47 = arith.constant 0.000000e+00 : f32
    %110 = vector.broadcast %cst_47 : f32 to vector<32x128xf32>
    %c0_48 = arith.constant 0 : index
    %c0_49 = arith.constant 0 : index
    %111 = vector.load %arg7[%c0_48, %c0_49] : memref<1x128xf32, #tpu.memory_space<vmem>>, vector<1x128xf32>
    %112 = vector.shape_cast %111 : vector<1x128xf32> to vector<128xf32>
    %113 = vector.shape_cast %112 : vector<128xf32> to vector<1x128xf32>
    %114 = vector.broadcast %113 : vector<1x128xf32> to vector<32x128xf32>
    %115 = arith.addf %110, %114 : vector<32x128xf32>
    %c5 = arith.constant 5 : index
    %c0_50 = arith.constant 0 : index
    %116 = vector.load %arg14[%c5, %c0_50] : memref<43x128xf32, #tpu.memory_space<vmem>>, vector<32x128xf32>
    %c0_51 = arith.constant 0 : index
    %c0_52 = arith.constant 0 : index
    %117 = vector.load %arg6[%c0_51, %c0_52] : memref<7x128xf32, #tpu.memory_space<vmem>>, vector<1x128xf32>
    %118 = vector.shape_cast %117 : vector<1x128xf32> to vector<128xf32>
    %119 = vector.shape_cast %118 : vector<128xf32> to vector<1x128xf32>
    %120 = vector.broadcast %119 : vector<1x128xf32> to vector<32x128xf32>
    %121 = arith.mulf %116, %120 : vector<32x128xf32>
    %122 = arith.addf %115, %121 : vector<32x128xf32>
    %c6 = arith.constant 6 : index
    %c0_53 = arith.constant 0 : index
    %123 = vector.load %arg14[%c6, %c0_53] : memref<43x128xf32, #tpu.memory_space<vmem>>, vector<32x128xf32>
    %c1 = arith.constant 1 : index
    %c0_54 = arith.constant 0 : index
    %124 = vector.load %arg6[%c1, %c0_54] : memref<7x128xf32, #tpu.memory_space<vmem>>, vector<1x128xf32>
    %125 = vector.shape_cast %124 : vector<1x128xf32> to vector<128xf32>
    %126 = vector.shape_cast %125 : vector<128xf32> to vector<1x128xf32>
    %127 = vector.broadcast %126 : vector<1x128xf32> to vector<32x128xf32>
    %128 = arith.mulf %123, %127 : vector<32x128xf32>
    %129 = arith.addf %122, %128 : vector<32x128xf32>
    %c7 = arith.constant 7 : index
    %c0_55 = arith.constant 0 : index
    %130 = vector.load %arg14[%c7, %c0_55] : memref<43x128xf32, #tpu.memory_space<vmem>>, vector<32x128xf32>
    %c2 = arith.constant 2 : index
    %c0_56 = arith.constant 0 : index
    %131 = vector.load %arg6[%c2, %c0_56] : memref<7x128xf32, #tpu.memory_space<vmem>>, vector<1x128xf32>
    %132 = vector.shape_cast %131 : vector<1x128xf32> to vector<128xf32>
    %133 = vector.shape_cast %132 : vector<128xf32> to vector<1x128xf32>
    %134 = vector.broadcast %133 : vector<1x128xf32> to vector<32x128xf32>
    %135 = arith.mulf %130, %134 : vector<32x128xf32>
    %136 = arith.addf %129, %135 : vector<32x128xf32>
    %c8 = arith.constant 8 : index
    %c0_57 = arith.constant 0 : index
    %137 = vector.load %arg14[%c8, %c0_57] : memref<43x128xf32, #tpu.memory_space<vmem>>, vector<32x128xf32>
    %c3 = arith.constant 3 : index
    %c0_58 = arith.constant 0 : index
    %138 = vector.load %arg6[%c3, %c0_58] : memref<7x128xf32, #tpu.memory_space<vmem>>, vector<1x128xf32>
    %139 = vector.shape_cast %138 : vector<1x128xf32> to vector<128xf32>
    %140 = vector.shape_cast %139 : vector<128xf32> to vector<1x128xf32>
    %141 = vector.broadcast %140 : vector<1x128xf32> to vector<32x128xf32>
    %142 = arith.mulf %137, %141 : vector<32x128xf32>
    %143 = arith.addf %136, %142 : vector<32x128xf32>
    %c9 = arith.constant 9 : index
    %c0_59 = arith.constant 0 : index
    %144 = vector.load %arg14[%c9, %c0_59] : memref<43x128xf32, #tpu.memory_space<vmem>>, vector<32x128xf32>
    %c4 = arith.constant 4 : index
    %c0_60 = arith.constant 0 : index
    %145 = vector.load %arg6[%c4, %c0_60] : memref<7x128xf32, #tpu.memory_space<vmem>>, vector<1x128xf32>
    %146 = vector.shape_cast %145 : vector<1x128xf32> to vector<128xf32>
    %147 = vector.shape_cast %146 : vector<128xf32> to vector<1x128xf32>
    %148 = vector.broadcast %147 : vector<1x128xf32> to vector<32x128xf32>
    %149 = arith.mulf %144, %148 : vector<32x128xf32>
    %150 = arith.addf %143, %149 : vector<32x128xf32>
    %c10 = arith.constant 10 : index
    %c0_61 = arith.constant 0 : index
    %151 = vector.load %arg14[%c10, %c0_61] : memref<43x128xf32, #tpu.memory_space<vmem>>, vector<32x128xf32>
    %c5_62 = arith.constant 5 : index
    %c0_63 = arith.constant 0 : index
    %152 = vector.load %arg6[%c5_62, %c0_63] : memref<7x128xf32, #tpu.memory_space<vmem>>, vector<1x128xf32>
    %153 = vector.shape_cast %152 : vector<1x128xf32> to vector<128xf32>
    %154 = vector.shape_cast %153 : vector<128xf32> to vector<1x128xf32>
    %155 = vector.broadcast %154 : vector<1x128xf32> to vector<32x128xf32>
    %156 = arith.mulf %151, %155 : vector<32x128xf32>
    %157 = arith.addf %150, %156 : vector<32x128xf32>
    %c11 = arith.constant 11 : index
    %c0_64 = arith.constant 0 : index
    %158 = vector.load %arg14[%c11, %c0_64] : memref<43x128xf32, #tpu.memory_space<vmem>>, vector<32x128xf32>
    %c6_65 = arith.constant 6 : index
    %c0_66 = arith.constant 0 : index
    %159 = vector.load %arg6[%c6_65, %c0_66] : memref<7x128xf32, #tpu.memory_space<vmem>>, vector<1x128xf32>
    %160 = vector.shape_cast %159 : vector<1x128xf32> to vector<128xf32>
    %161 = vector.shape_cast %160 : vector<128xf32> to vector<1x128xf32>
    %162 = vector.broadcast %161 : vector<1x128xf32> to vector<32x128xf32>
    %163 = arith.mulf %158, %162 : vector<32x128xf32>
    %164 = arith.addf %157, %163 : vector<32x128xf32>
    %cst_67 = arith.constant dense<0.000000e+00> : vector<32xf32>
    %165 = vector.multi_reduction <add>, %164, %cst_67 [1] : vector<32x128xf32> to vector<32xf32>
    %166 = vector.shape_cast %165 : vector<32xf32> to vector<32x1xf32>
    %167 = arith.mulf %164, %164 : vector<32x128xf32>
    %cst_68 = arith.constant dense<0.000000e+00> : vector<32xf32>
    %168 = vector.multi_reduction <add>, %167, %cst_68 [1] : vector<32x128xf32> to vector<32xf32>
    %169 = vector.shape_cast %168 : vector<32xf32> to vector<32x1xf32>
    %cst_69 = arith.constant 7.812500e-03 : f32
    %170 = vector.broadcast %cst_69 : f32 to vector<32x1xf32>
    %171 = arith.mulf %166, %170 : vector<32x1xf32>
    %cst_70 = arith.constant 7.812500e-03 : f32
    %172 = vector.broadcast %cst_70 : f32 to vector<32x1xf32>
    %173 = arith.mulf %169, %172 : vector<32x1xf32>
    %174 = arith.mulf %171, %171 : vector<32x1xf32>
    %175 = arith.subf %173, %174 : vector<32x1xf32>
    %176 = vector.broadcast %171 : vector<32x1xf32> to vector<32x128xf32>
    %177 = arith.subf %164, %176 : vector<32x128xf32>
    %cst_71 = arith.constant 9.99999974E-6 : f32
    %178 = vector.broadcast %cst_71 : f32 to vector<32x1xf32>
    %179 = arith.addf %175, %178 : vector<32x1xf32>
    %180 = math.rsqrt %179 : vector<32x1xf32>
    %181 = vector.broadcast %180 : vector<32x1xf32> to vector<32x128xf32>
    %182 = arith.mulf %177, %181 : vector<32x128xf32>
    %c0_72 = arith.constant 0 : index
    %c0_73 = arith.constant 0 : index
    %183 = vector.load %arg8[%c0_72, %c0_73] : memref<1x128xf32, #tpu.memory_space<vmem>>, vector<1x128xf32>
    %184 = vector.shape_cast %183 : vector<1x128xf32> to vector<128xf32>
    %185 = vector.shape_cast %184 : vector<128xf32> to vector<1x128xf32>
    %186 = vector.broadcast %185 : vector<1x128xf32> to vector<32x128xf32>
    %187 = arith.mulf %182, %186 : vector<32x128xf32>
    %c0_74 = arith.constant 0 : index
    %c0_75 = arith.constant 0 : index
    %188 = vector.load %arg9[%c0_74, %c0_75] : memref<1x128xf32, #tpu.memory_space<vmem>>, vector<1x128xf32>
    %189 = vector.shape_cast %188 : vector<1x128xf32> to vector<128xf32>
    %190 = vector.shape_cast %189 : vector<128xf32> to vector<1x128xf32>
    %191 = vector.broadcast %190 : vector<1x128xf32> to vector<32x128xf32>
    %192 = arith.addf %187, %191 : vector<32x128xf32>
    %193 = arith.negf %192 : vector<32x128xf32>
    %194 = math.exp %193 : vector<32x128xf32>
    %cst_76 = arith.constant 1.000000e+00 : f32
    %195 = vector.broadcast %cst_76 : f32 to vector<32x128xf32>
    %196 = arith.addf %195, %194 : vector<32x128xf32>
    %197 = arith.divf %195, %196 : vector<32x128xf32>
    %198 = arith.mulf %192, %197 : vector<32x128xf32>
    %199 = arith.truncf %198 : vector<32x128xf32> to vector<32x128xbf16>
    %c0_77 = arith.constant 0 : index
    %c0_78 = arith.constant 0 : index
    %200 = vector.load %arg10[%c0_77, %c0_78] : memref<128x128xbf16, #tpu.memory_space<vmem>>, vector<128x128xbf16>
    %cst_79 = arith.constant dense<0.000000e+00> : vector<32x128xf32>
    %201 = tpu.matmul %199, %200, %cst_79 {dimension_numbers = #tpu.dot_dimension_numbers<[1], [0], [0], [1], [0, 0, 1, 1], [], []>} : vector<32x128xbf16>, vector<128x128xbf16>, vector<32x128xf32> -> vector<32x128xf32>
    %c0_80 = arith.constant 0 : index
    %c0_81 = arith.constant 0 : index
    %202 = vector.load %arg11[%c0_80, %c0_81] : memref<1x128xf32, #tpu.memory_space<vmem>>, vector<1x128xf32>
    %203 = vector.shape_cast %202 : vector<1x128xf32> to vector<128xf32>
    %204 = vector.shape_cast %203 : vector<128xf32> to vector<1x128xf32>
    %205 = vector.broadcast %204 : vector<1x128xf32> to vector<32x128xf32>
    %206 = arith.addf %201, %205 : vector<32x128xf32>
    %c0_82 = arith.constant 0 : index
    %c0_83 = arith.constant 0 : index
    %c0_84 = arith.constant 0 : index
    %207 = vector.load %arg12[%c0_82, %c0_83, %c0_84] : memref<1x32x128xf32, #tpu.memory_space<vmem>>, vector<1x32x128xf32>
    %208 = vector.shape_cast %207 : vector<1x32x128xf32> to vector<32x128xf32>
    %209 = vector.shape_cast %206 : vector<32x128xf32> to vector<1x32x128xf32>
    tpu.vector_store %arg12[%c0_82, %c0_83, %c0_84], %209 {strides = array<i32>} : memref<1x32x128xf32, #tpu.memory_space<vmem>>, vector<1x32x128xf32>,
    return
  }
  func.func @transform_1(%arg0: i32, %arg1: i32) -> (i32, i32, i32) {
    %c0_i32 = arith.constant 0 : i32
    %c0_i32_0 = arith.constant 0 : i32
    return %arg0, %arg1, %c0_i32 : i32, i32, i32
  }
  func.func @transform_2(%arg0: i32, %arg1: i32) -> (i32, i32) {
    %c0_i32 = arith.constant 0 : i32
    %c0_i32_0 = arith.constant 0 : i32
    %c0_i32_1 = arith.constant 0 : i32
    return %c0_i32, %c0_i32_0 : i32, i32
  }
  func.func @transform_3(%arg0: i32, %arg1: i32) -> (i32, i32) {
    %c0_i32 = arith.constant 0 : i32
    %c0_i32_0 = arith.constant 0 : i32
    %c0_i32_1 = arith.constant 0 : i32
    return %c0_i32, %c0_i32_0 : i32, i32
  }
  func.func @transform_4(%arg0: i32, %arg1: i32) -> (i32, i32) {
    %c0_i32 = arith.constant 0 : i32
    %c0_i32_0 = arith.constant 0 : i32
    %c0_i32_1 = arith.constant 0 : i32
    return %c0_i32, %c0_i32_0 : i32, i32
  }
  func.func @transform_5(%arg0: i32, %arg1: i32) -> (i32, i32) {
    %c0_i32 = arith.constant 0 : i32
    %c0_i32_0 = arith.constant 0 : i32
    %c0_i32_1 = arith.constant 0 : i32
    return %c0_i32, %c0_i32_0 : i32, i32
  }
  func.func @transform_6(%arg0: i32, %arg1: i32) -> (i32, i32) {
    %c0_i32 = arith.constant 0 : i32
    %c0_i32_0 = arith.constant 0 : i32
    %c0_i32_1 = arith.constant 0 : i32
    return %c0_i32, %c0_i32_0 : i32, i32
  }
  func.func @transform_7(%arg0: i32, %arg1: i32) -> (i32, i32) {
    %c0_i32 = arith.constant 0 : i32
    %c0_i32_0 = arith.constant 0 : i32
    %c0_i32_1 = arith.constant 0 : i32
    return %c0_i32, %c0_i32_0 : i32, i32
  }
  func.func @transform_8(%arg0: i32, %arg1: i32) -> (i32, i32) {
    %c0_i32 = arith.constant 0 : i32
    %c0_i32_0 = arith.constant 0 : i32
    %c0_i32_1 = arith.constant 0 : i32
    return %c0_i32, %c0_i32_0 : i32, i32
  }
  func.func @transform_9(%arg0: i32, %arg1: i32) -> (i32, i32) {
    %c0_i32 = arith.constant 0 : i32
    %c0_i32_0 = arith.constant 0 : i32
    %c0_i32_1 = arith.constant 0 : i32
    return %c0_i32, %c0_i32_0 : i32, i32
  }
  func.func @transform_10(%arg0: i32, %arg1: i32) -> (i32, i32, i32) {
    %c0_i32 = arith.constant 0 : i32
    %c0_i32_0 = arith.constant 0 : i32
    return %arg0, %arg1, %c0_i32 : i32, i32, i32
  }
}

</mosaic_0001>

<bundles_post_ra>
// kernel: tpu_custom_call.1
= control target key start
LH: loop header
LB: loop body
LE: loop exit
PB: predicated region body
PF: predicated region fallthrough
CT: control target
= control target key end

     0   :  { %s2624_s0 = inlined_call_operand.hbm [shape: f32[2,56,128], index: 0, kind: input, shape index: {}]   ;;  %s2625_s1 = inlined_call_operand.hbm [shape: f32[2,56,128], index: 1, kind: input, shape index: {}]   ;;  %s2626_s2 = inlined_call_operand.hbm [shape: bf16[128,256], index: 2, kind: input, shape index: {}]   ;;  %s2627_s3 = inlined_call_operand.vmem [shape: f32[1,256], index: 3, kind: input, shape index: {}]   ;;  %s2628_s4 = inlined_call_operand.vmem [shape: f32[7,128], index: 4, kind: input, shape index: {}]   ;;  %s2629_s5 = inlined_call_operand.vmem [shape: f32[1,128], index: 5, kind: input, shape index: {}]   ;;  %s2630_s6 = inlined_call_operand.vmem [shape: f32[1,128], index: 6, kind: input, shape index: {}]   ;;  %s2631_s7 = inlined_call_operand.vmem [shape: f32[1,128], index: 7, kind: input, shape index: {}]   ;;  %s2632_s8 = inlined_call_operand.hbm [shape: bf16[128,128], index: 8, kind: input, shape index: {}]   ;;  %s2633_s9 = inlined_call_operand.vmem [shape: f32[1,128], index: 9, kind: input, shape index: {}]   ;;  %s2634_s10 = inlined_call_operand.hbm [shape: f32[2,56,128], index: 10, kind: output, shape index: {}]  }
   0x1   :  { %2647 = sst [smem:[#allocation29_spill]] %s2625_s1 }
   0x2   :  { %2648 = sst [smem:[#allocation30_spill]] %s2626_s2 }
   0x3   :  { %2649 = sst [smem:[#allocation31_spill]] %s2628_s4 }
   0x4   :  { %2650 = sst [smem:[#allocation32_spill]] %s2630_s6 }
   0x5   :  { %2651 = sst [smem:[#allocation33_spill]] %s2631_s7 }
   0x6   :  { %2652 = sst [smem:[#allocation34_spill]] %s2632_s8 }
   0x7   :  { %2653 = sst [smem:[#allocation35_spill]] %s2633_s9 }
   0x8   :  { %2654 = sst [smem:[#allocation36_spill]] %s2634_s10 }
   0x9   :  { %15 = vsyncpa [#allocation6], 0 }
   0xa   :  { %17 = vsyncpa [#allocation6 + $0x1], 0 }
   0xb   :  { %18 = vsyncpa [#allocation9], 0 }
   0xc   :  { %19 = vsyncpa [#allocation7], 0 }
   0xd   :  { %21 = vsyncpa [#allocation7 + $0x1], 0  ;;  %s2134_s13 = smov 0   ;;  %s2136_s14 = smov 0  }
   0xe   :  { %s2138_s15 = smov 0   ;;  %s2140_s16 = smov 0  }
   0xf   :  { %s2142_s17 = smov 0   ;;  %s2144_s18 = smov 0  }
  0x10   :  { %s2146_s19 = smov 0   ;;  %s2148_s20 = smov 0  }
  0x11 LB: > { %2655 = sst [smem:[#allocation23_spill]] %s2034_s13  ;;  %s1476_s21 = sadd.s32 4294967295, %s2062_s20   ;;  %s2062_s20 = sphi %s2148_s20, %s27_s20   ;;  %s2058_s19 = sphi %s2146_s19, %s2697_s19   ;;  %s2054_s18 = sphi %s2144_s18, %s2696_s18   ;;  %s2050_s17 = sphi %s2142_s17, %s2695_s17   ;;  %s2046_s16 = sphi %s2140_s16, %s2694_s16   ;;  %s2042_s15 = sphi %s2138_s15, %s2693_s15   ;;  %s2038_s14 = sphi %s2136_s14, %s2692_s14   ;;  %s2034_s13 = sphi %s2134_s13, %s2691_s13  }
  0x12   : > { %s1477_s22 = sadd.s32 4294967294, %s2062_s20   ;;  %s36_s23 = sadd.s32 1, %s2054_s18 }
  0x13   : > { %s39_s24 = sadd.s32 1, %s2058_s19  ;;  %p37_p0 = scmp.ge.s32.totalorder %s36_s23, 2 }
  0x14   : > { %s48_s25 = sadd.s32 1, %s2042_s15  ;;  %p55_p1 = scmp.ne.s32.totalorder %s2042_s15, %s2038_s14 }
  0x15   : > { %p56_p2 = scmp.eq.s32.totalorder %s2062_s20, 0  ;;  %s2699_s23 = smov (%p37_p0, %s36_s23), 0 }
  0x16   : > { %2656 = sst [smem:[#allocation24_spill]] %s2699_s23  ;;  %s2701_s24 = smov (!%p37_p0, %s39_s24), %s2058_s19 }
  0x17   : > { %s44_s26 = ssub.s32 %s2054_s18, %s2699_s23  ;;  %p2187_p3 = por %p56_p2, %p55_p1 }
  0x18   : > { %p41_p4 = scmp.ge.s32.totalorder %s2701_s24, 2  ;;  %p61_p5 = scmp.ne.s32.totalorder %s2038_s14, %s2034_s13 }
  0x19   : > { %s2657_s27 = scalar_select %p2187_p3, 1, 0 }
  0x1a   : > { %p2193_p6 = scmp.eq.s32.totalorder %s1476_s21, 0  ;;  %p255_p7 = scmp.eq.s32.totalorder %s1476_s21, 3 }
  0x1b   : > { %s2703_s24 = smov (%p41_p4, %s2701_s24), 0  ;;  %p261_p10 = scmp.eq.s32.totalorder %s1477_s22, 3 }
  0x1c   : > { %s2658_s28 = scalar_select %p2193_p6, 1, 0 }
  0x1d   : > { %2659 = sst [smem:[#allocation25_spill]] %s2703_s24  ;;  %p2201_p8 = por %p2193_p6, %p61_p5 }
  0x1e   : > { %p2205_p9 = por %p255_p7, %p55_p1  ;;  %s43_s11 = ssub.s32 %s2058_s19, %s2703_s24 }
  0x1f   : > { %s2660_s29 = scalar_select %p2201_p8, 1, 0 }
  0x20   : > { %s2661_s30 = scalar_select %p2205_p9, 1, 0 }
  0x21   : > { %s45_s12 = sor.u32 %s44_s26, %s43_s11  ;;  %p1478_p11 = scmp.ge.s32.totalorder %s2062_s20, 1 }
  0x22   : > { %2662 = sst [smem:[#allocation26_spill]] %s2661_s30  ;;  %p46_p12 = scmp.eq.s32.totalorder %s45_s12, 0 }
  0x23   : > { %p2212_p13 = por %p261_p10, %p61_p5  ;;  %p268_p0 = scmp.lt.s32.totalorder %s2062_s20, 5 }
  0x24   : > { %s2218_s23 = scalar_select %p46_p12, %s2042_s15, %s48_s25  }
  0x25   : > { %s2663_s21 = scalar_select %p2212_p13, 1, 0 }
  0x26   : > { %2665 = sst [smem:[#allocation28_spill]] %s2218_s23  ;;  %p2220_p2 = pnand %p1478_p11, %p268_p0 }
  0x27   : > { %2664 = sst [smem:[#allocation27_spill]] %s2663_s21  ;;  %s2064_s10 = smov [#allocation8]  }
  0x28   : > { %s2666_s13 = scalar_select %p2220_p2, 1, 0 }
  0x29   : > { %s280_s9 = sshll.u32 %s2064_s10, 4  ;;  %p1615_p1 = pneg %p2220_p2  ;;  %s281_s9 = int_to_ptr.vmem [resolvable:$true] %s280_s9 }
  0x2a   : > { %s2065_s26 = smov [#allocation10]   ;;  %s2668_s2 = sld [smem:[#allocation30_spill]] }
  0x2b   : > { %p2228_p4 = pnand %p1615_p1, %p2193_p6  ;;  %s308_s25 = sshll.u32 %s2065_s26, 4  ;;  %s2232_s25 = int_to_ptr.vmem [resolvable:$true] %s308_s25 }
  0x2d   : > { %p1826_p7 = pneg %p2228_p4 }
  0x30   : > { %s1824_s24 = scalar_lea.hbm %s2668_s2, 2048 }
  0x31   : > { %p1825_p5 = scmp.ne.s32.totalorder %s2668_s2, %s1824_s24  ;;  %p1831_p12 = scmp.lt.u32.totalorder %s1824_s24, %s2668_s2 }
  0x33   : > { %p1827_p10 = pnand %p1826_p7, %p1825_p5 }
  0x35   : > { %p1828_p11 = pneg %p1827_p10 }
  0x37   : > { %p1833_p0 = pnand %p1831_p12, %p1828_p11 }
  0x39   : > { %1836 = shalt.err (!%p1833_p0)
}
  0x3a   : > { %s1837_s26 = scalar_lea.vmem %s281_s9, 2048  ;;  %p1845_p6 = scmp.lt.s32.totalorder %s281_s9, %s281_s9 }
  0x3b   : > { %p1838_p1 = scmp.ne.s32.totalorder %s281_s9, %s1837_s26  ;;  %p1846_p8 = scmp.lt.s32.totalorder %s1837_s26, %s1837_s26 }
  0x3d   : > { %p1840_p13 = pnand %p1838_p1, %p1826_p7  ;;  %p1847_p2 = por %p1846_p8, %p1845_p6 }
  0x3f   : > { %p1841_p9 = pneg %p1840_p13 }
  0x41   : > { %p1848_p3 = pnand %p1847_p2, %p1841_p9 }
  0x43   : > { %1851 = shalt.err (!%p1848_p3)
}
  0x44   : > { %s2066_s23 = smov 128   ;;  %s2067_s11 = smov 8  }
  0x45   : > { %1618 = dma.hbm_to_vmem [thread:$0]  (!%p2228_p4), %s2668_s2, 2048, %s281_s9, [#allocation9], %s2066_s23, %s2066_s23, %s2067_s11  }
  0x46   : > { %s2669_s8 = sld [smem:[#allocation34_spill]] }
  0x4c   : > { %s1852_s10 = scalar_lea.hbm %s2669_s8, 1024 }
  0x4d   : > { %p1853_p13 = scmp.ne.s32.totalorder %s2669_s8, %s1852_s10  ;;  %p1859_p8 = scmp.lt.u32.totalorder %s1852_s10, %s2669_s8 }
  0x4f   : > { %p1855_p3 = pnand %p1853_p13, %p1826_p7 }
  0x51   : > { %p1856_p6 = pneg %p1855_p3 }
  0x53   : > { %p1861_p9 = pnand %p1859_p8, %p1856_p6 }
  0x55   : > { %1864 = shalt.err (!%p1861_p9)
}
  0x56   : > { %s1865_s9 = scalar_lea.vmem %s2232_s25, 1024  ;;  %p1873_p11 = scmp.lt.s32.totalorder %s2232_s25, %s2232_s25 }
  0x57   : > { %p1866_p2 = scmp.ne.s32.totalorder %s2232_s25, %s1865_s9  ;;  %p1874_p12 = scmp.lt.s32.totalorder %s1865_s9, %s1865_s9 }
  0x59   : > { %p1868_p5 = pnand %p1866_p2, %p1826_p7  ;;  %p1875_p0 = por %p1874_p12, %p1873_p11 }
  0x5b   : > { %p1869_p10 = pneg %p1868_p5 }
  0x5d   : > { %p1876_p1 = pnand %p1875_p0, %p1869_p10 }
  0x5f   : > { %1879 = shalt.err (!%p1876_p1)
}
  0x60   : > { %s2068_s4 = smov 64   ;;  %s2069_s6 = smov 4  }
  0x61   : > { %1621 = dma.hbm_to_vmem [thread:$0]  (!%p2228_p4), %s2669_s8, 1024, %s2232_s25, [#allocation9], %s2068_s4, %s2068_s4, %s2069_s6  }
  0x62   : > { %p1481_p13 = scmp.ge.s32.totalorder %s2062_s20, 4 }
  0x63   : > { %p2670_p7 = scmp.ne.s32.totalorder (!%p1481_p13), %s2657_s27, 0 }
  0x64   : > { %321 = sbr.rel (%p1481_p13) target bundleno = 147 (0x93), region = 48 }
  0x6b   : > { %324 = sbr.rel (!%p2670_p7) target bundleno = 147 (0x93), region = 52  ;;  %s325_s11 = sand.u32 (%p2670_p7), 1, %s2042_s15  }
  0x6c   : > { %s1483_s24 = sshll.u32 (%p2670_p7), %s2054_s18, 2  ;;  %s1482_s30 = sshll.u32 (%p2670_p7), %s325_s11, 5 }
  0x6d   : > { %s331_s21 = ssub.s32 (%p2670_p7), 7, %s1483_s24  ;;  %s2289_s10 = scalar_lea.sflag (%p2670_p7), [#allocation6], %s325_s11 }
  0x6e   : > { %p332_p3 = scmp.lt.s32.totalorder (%p2670_p7), %s331_s21, 4  ;;  %s329_s25 = scalar_lea.vmem (%p2670_p7), [#allocation5], %s1482_s30 }
  0x72   : > { %s2705_s21 = smov (!%p332_p3, %s331_s21), 4 }
  0x73   : > { %s2286_s12 = sshll.u32 %s2705_s21, 7 }
  0x74   : > { %s336_s22 = ssub.s32 512, %s2286_s12 }
  0x75   : > { %337 = vsyncadd %s2289_s10, %s336_s22  ;;  %p1485_p4 = scmp.ne.s32.totalorder %s2286_s12, 0  ;;  %s1603_s27 = smul.u32 7, %s2058_s19 }
  0x76   : > { %s344_s26 = sshll.u32 %s329_s25, 4  ;;  %s2671_s1 = sld [smem:[#allocation29_spill]]  ;;  %s2294_s26 = int_to_ptr.vmem [resolvable:$true] %s344_s26 }
  0x77   : > { %s340_s9 = sadd.s32 %s1603_s27, %s1483_s24 }
  0x78   : > { %s1486_s4 = sshll.u32 %s340_s9, 7 }
  0x7c   : > { %s2299_s23 = scalar_lea.hbm %s2671_s1, %s1486_s4  ;;  %s1884_s24 = scalar_lea.hbm %s2671_s1, 1792 }
  0x7d   : > { %s1880_s11 = scalar_lea.hbm %s2299_s23, %s2286_s12  ;;  %p1885_p2 = scmp.lt.u32.totalorder %s2299_s23, %s2671_s1 }
  0x7e   : > { %p1881_p6 = scmp.ne.s32.totalorder %s2299_s23, %s1880_s11  ;;  %p1886_p5 = scmp.lt.u32.totalorder %s1884_s24, %s1880_s11 }
  0x7f   : > { %p1888_p11 = scmp.lt.u32.totalorder %s1880_s11, %s2299_s23 }
  0x80   : > { %p1882_p8 = pnand %p1881_p6, %p1485_p4  ;;  %p1887_p10 = por %p1886_p5, %p1885_p2 }
  0x82   : > { %p1883_p9 = pneg %p1882_p8  ;;  %p1889_p12 = por %p1888_p11, %p1887_p10 }
  0x84   : > { %p1890_p0 = pnand %p1889_p12, %p1883_p9 }
  0x86   : > { %1893 = shalt.err (!%p1890_p0)
}
  0x87   : > { %s1894_s27 = scalar_lea.vmem %s2294_s26, %s2286_s12  ;;  %s2070_s9 = smov [#allocation5]  }
  0x88   : > { %p1895_p1 = scmp.ne.s32.totalorder %s2294_s26, %s1894_s27  ;;  %s1898_s4 = sshll.u32 %s2070_s9, 4  ;;  %s1899_s4 = int_to_ptr.vmem [resolvable:$false] %s1898_s4 }
  0x89   : > { %s1900_s6 = scalar_lea.vmem %s1899_s4, 1024  ;;  %p1901_p3 = scmp.lt.s32.totalorder %s2294_s26, %s1899_s4 }
  0x8a   : > { %p1896_p13 = pnand %p1895_p1, %p1485_p4  ;;  %p1902_p6 = scmp.lt.s32.totalorder %s1900_s6, %s1894_s27 }
  0x8c   : > { %p1897_p7 = pneg %p1896_p13  ;;  %p1903_p8 = por %p1902_p6, %p1901_p3 }
  0x8e   : > { %p1904_p2 = pnand %p1903_p8, %p1897_p7 }
  0x90   : > { %1907 = shalt.err (!%p1904_p2)
}
  0x91   : > { %s2071_s7 = smov 128   ;;  %s2072_s11 = smov 8  }
  0x92   : > { %350 = dma.hbm_to_vmem [thread:$0]  (%p1485_p4), %s2299_s23, %s2286_s12, %s2294_s26, %s2289_s10, %s2071_s7, %s2071_s7, %s2072_s11  }
  0x93 PF: > { %p2672_p9 = scmp.ne.s32.totalorder %s2666_s13, 0 }
  0x94   : > { %s2329_s30 = sand.u32 (!%p2672_p9), 1, %s2038_s14   ;;  %p2673_p5 = scmp.ne.s32.totalorder (!%p2672_p9), %s2660_s29, 0 }
  0x95   : > { %356 = sbr.rel (%p2672_p9) target bundleno = 1492 (0x5d4), region = 56  ;;  %s2646_s21 = sshll.u32 (!%p2672_p9), %s2329_s30, 5 }
  0x96   : > { %s359_s24 = scalar_lea.sflag (!%p2672_p9), [#allocation6], %s2329_s30  ;;  %s362_s22 = scalar_lea.vmem (!%p2672_p9), [#allocation5], %s2646_s21 }
  0x9c   : > { %2017 = dma.done.wait (%p2673_p5), %s359_s24, 512  }
  0x9d   : > { %2019 = vsyncadd (%p2673_p5), %s359_s24, 4294966784  ;;  %p2674_p4 = scmp.ne.s32.totalorder %s2658_s28, 0 }
  0x9f   : > { %2021 = dma.done.wait (%p2674_p4), [#allocation9], 3072  }
  0xa0   : > { %2023 = vsyncadd (%p2674_p4), [#allocation9], 4294964224  ;;  %v2343_v0 = vld [vmem:[%s362_s22] sm:$0xff]  ;;  %v2345_v1 = vld [vmem:[%s362_s22 + $0x8] sm:$0xff]  ;;  %v2073_v24 = vmov 0   ;;  %s2370_s13 = sshll.u32 %s2046_s16, 5 }
  0xa1   : > { %459 = vadd.xlane.f32.xlu0 %v2343_v0  ;;  %v467_v2 = vmul.f32 %v2343_v0, %v2343_v0  ;;  %v1708_v3 = vld [vmem:[#allocation8 + $0x4] ss:$8 sps:$4 sm:$0xff]   ;;  %v1710_v4 = vld [vmem:[#allocation8] ss:$8 sps:$4 sm:$0xff]   ;;  %v468_v5 = vmul.f32 %v2345_v1, %v2345_v1  ;;  %v1711_v6 = vld [vmem:[#allocation8 + $0x14] ss:$8 sps:$4 sm:$0xff]   ;;  %653 = vmatprep.mubr.bf16.mxu0 %v2073_v24 }
  0xa2   : > { %v2352_v7 = vld [vmem:[%s362_s22 + $0x10] sm:$0xff]  ;;  %621 = vmatprep.subr.bf16.mxu0 %v1708_v3  ;;  %v2355_v8 = vld [vmem:[%s362_s22 + $0x18] sm:$0xff]  ;;  %v1714_v12 = vld [vmem:[#allocation8 + $0x24] ss:$8 sps:$4 sm:$0xff]   ;;  %s2373_s28 = sadd.s32 4294967293, %s2370_s13  ;;  %s2377_s29 = sadd.s32 32, %s2370_s13 }
  0xa3   : > { %471 = vadd.xlane.f32.xlu1 %v467_v2  ;;  %622 = vmatpush1.bf16.msra.mxu0 %v1710_v4  ;;  %v469_v9 = vmul.f32 %v2352_v7, %v2352_v7  ;;  %v470_v10 = vmul.f32 %v2355_v8, %v2355_v8  ;;  %v1713_v11 = vld [vmem:[#allocation8 + $0x10] ss:$8 sps:$4 sm:$0xff]   ;;  %v1716_v13 = vld [vmem:[#allocation8 + $0x20] ss:$8 sps:$4 sm:$0xff]   ;;  %v1717_v14 = vld [vmem:[#allocation8 + $0x34] ss:$8 sps:$4 sm:$0xff]  }
  0xa4   : > { %623 = vmatprep.subr.bf16.mxu0 %v1711_v6  ;;  %v1719_v15 = vld [vmem:[#allocation8 + $0x30] ss:$8 sps:$4 sm:$0xff]   ;;  %v1720_v16 = vld [vmem:[#allocation8 + $0x44] ss:$8 sps:$4 sm:$0xff]   ;;  %v1722_v17 = vld [vmem:[#allocation8 + $0x40] ss:$8 sps:$4 sm:$0xff]  }
  0xa5   : > { %461 = vadd.xlane.f32.xlu0 %v2345_v1  ;;  %v1723_v18 = vld [vmem:[#allocation8 + $0x54] ss:$8 sps:$4 sm:$0xff]   ;;  %v1725_v19 = vld [vmem:[#allocation8 + $0x50] ss:$8 sps:$4 sm:$0xff]   ;;  %v1726_v20 = vld [vmem:[#allocation8 + $0x64] ss:$8 sps:$4 sm:$0xff]  }
  0xa6   : > { %v1728_v21 = vld [vmem:[#allocation8 + $0x60] ss:$8 sps:$4 sm:$0xff]   ;;  %v1729_v22 = vld [vmem:[#allocation8 + $0x74] ss:$8 sps:$4 sm:$0xff]   ;;  %v1731_v23 = vld [vmem:[#allocation8 + $0x70] ss:$8 sps:$4 sm:$0xff]  }
  0xa7   : > { %473 = vadd.xlane.f32.xlu1 %v468_v5  ;;  %624 = vmatpush1.bf16.msra.mxu0 %v1713_v11  ;;  %p418_p10 = scmp.gt.s32.totalorder %s2373_s28, 0  ;;  %s420_s10 = smul.u32 56, %s2050_s17 }
  0xa8   : > { %625 = vmatprep.subr.bf16.mxu0 %v1714_v12  ;;  %p437_p11 = scmp.lt.s32.totalorder %s2377_s29, 53  ;;  %s2074_s23 = smov [#allocation2]  }
  0xa9   : > { %463 = vadd.xlane.f32.xlu0 %v2352_v7  ;;  %s419_s12 = scalar_select %p418_p10, %s2373_s28, 0 }
  0xaa   : > { %s431_s25 = sshll.u32 %s2074_s23, 4  ;;  %s2075_s7 = smov [#allocation2 + $0x6]   ;;  %s2384_s25 = int_to_ptr.vmem [resolvable:$true] %s431_s25 }
  0xab   : > { %465 = vadd.xlane.f32.xlu1 %v2355_v8  ;;  %626 = vmatpush1.bf16.msra.mxu0 %v1716_v13  ;;  %s421_s26 = sadd.s32 %s420_s10, %s419_s12  ;;  %s451_s11 = sshll.u32 %s2075_s7, 4  ;;  %s452_s11 = int_to_ptr.vmem [resolvable:$true] %s451_s11 }
  0xac   : > { %627 = vmatprep.subr.bf16.mxu0 %v1717_v14  ;;  %s1496_s27 = sshll.u32 %s421_s26, 4  ;;  %s1910_s1 = scalar_lea.hbm %s2624_s0, 1792 }
  0xad   : > { %475 = vadd.xlane.f32.xlu0 %v469_v9  ;;  %s423_s6 = scalar_lea.hbm %s2624_s0, %s1496_s27 }
  0xae   : > { %s1908_s24 = scalar_lea.hbm %s423_s6, 48  ;;  %p1911_p0 = scmp.lt.u32.totalorder %s423_s6, %s2624_s0 }
  0xaf   : > { %477 = vadd.xlane.f32.xlu1 %v470_v10  ;;  %628 = vmatpush1.bf16.msra.mxu0 %v1719_v15  ;;  %p1909_p12 = scmp.ne.s32.totalorder %s423_s6, %s1908_s24  ;;  %p1912_p1 = scmp.lt.u32.totalorder %s1910_s1, %s1908_s24 }
  0xb0   : > { %629 = vmatprep.subr.bf16.mxu0 %v1720_v16  ;;  %p1914_p7 = scmp.lt.u32.totalorder %s1908_s24, %s423_s6 }
  0xb1   : > { %p1913_p13 = por %p1912_p1, %p1911_p0 }
  0xb3   : > { %630 = vmatpush1.bf16.msra.mxu0 %v1722_v17  ;;  %p1915_p3 = por %p1914_p7, %p1913_p13 }
  0xb4   : > { %631 = vmatprep.subr.bf16.mxu0 %v1723_v18 }
  0xb5   : > { %p1916_p6 = pnand %p1915_p3, %p1909_p12 }
  0xb7   : > { %632 = vmatpush1.bf16.msra.mxu0 %v1725_v19 }
  0xb8   : > { %633 = vmatprep.subr.bf16.mxu0 %v1726_v20 }
  0xbb   : > { %634 = vmatpush1.bf16.msra.mxu0 %v1728_v21 }
  0xbc   : > { %635 = vmatprep.subr.bf16.mxu0 %v1729_v22 }
  0xbf   : > { %636 = vmatpush1.bf16.msra.mxu0 %v1731_v23 }
 0x12e   : > { %v460_v25 = vpop.xlane.xlu0 %459 }
 0x12f   : > { %v479_v26 = vmul.f32 0.0078125, %v460_v25 }
 0x130   : > { %v472_v27 = vpop.xlane.xlu1 %471 }
 0x131   : > { %v487_v28 = vmul.f32 %v479_v26, %v479_v26  ;;  %v483_v29 = vmul.f32 0.0078125, %v472_v27  ;;  %v495_v54 = vsub.f32 %v2343_v0, %v479_v26 }
 0x132   : > { %v462_v30 = vpop.xlane.xlu0 %461 }
 0x133   : > { %v491_v31 = vsub.f32 %v483_v29, %v487_v28  ;;  %v480_v32 = vmul.f32 0.0078125, %v462_v30 }
 0x134   : > { %v474_v33 = vpop.xlane.xlu1 %473 }
 0x135   : > { %v499_v34 = vadd.f32 1e-05, %v491_v31  ;;  %v488_v35 = vmul.f32 %v480_v32, %v480_v32  ;;  %v484_v36 = vmul.f32 0.0078125, %v474_v33  ;;  %v496_v55 = vsub.f32 %v2345_v1, %v480_v32 }
 0x136   : > { %v464_v37 = vpop.xlane.xlu0 %463 }
 0x137   : > { %v492_v38 = vsub.f32 %v484_v36, %v488_v35  ;;  %v481_v39 = vmul.f32 0.0078125, %v464_v37  ;;  %1732 = vrsqrt.f32 %v499_v34 }
 0x138   : > { %v466_v40 = vpop.xlane.xlu1 %465 }
 0x139   : > { %v500_v41 = vadd.f32 1e-05, %v492_v38  ;;  %v489_v42 = vmul.f32 %v481_v39, %v481_v39  ;;  %v482_v43 = vmul.f32 0.0078125, %v466_v40  ;;  %v497_v61 = vsub.f32 %v2352_v7, %v481_v39 }
 0x13a   : > { %v476_v44 = vpop.xlane.xlu0 %475 }
 0x13b   : > { %1734 = vrsqrt.f32 %v500_v41  ;;  %v485_v45 = vmul.f32 0.0078125, %v476_v44  ;;  %v490_v47 = vmul.f32 %v482_v43, %v482_v43  ;;  %v498_v62 = vsub.f32 %v2355_v8, %v482_v43 }
 0x13c   : > { %v478_v46 = vpop.xlane.xlu1 %477 }
 0x13d   : > { %v493_v48 = vsub.f32 %v485_v45, %v489_v42  ;;  %v486_v49 = vmul.f32 0.0078125, %v478_v46 }
 0x13f   : > { %v501_v50 = vadd.f32 1e-05, %v493_v48  ;;  %v494_v51 = vsub.f32 %v486_v49, %v490_v47 }
 0x141   : > { %1736 = vrsqrt.f32 %v501_v50  ;;  %v502_v52 = vadd.f32 1e-05, %v494_v51  ;;  %v1733_v53 = vpop.eup %1732 }
 0x142   : > { %v507_v57 = vmul.f32 %v1733_v53, %v495_v54 }
 0x143   : > { %1738 = vrsqrt.f32 %v502_v52 }
 0x145   : > { %v1735_v56 = vpop.eup %1734 }
 0x146   : > { %v508_v58 = vmul.f32 %v1735_v56, %v496_v55 }
 0x148   : > { %v511_v59 = vpack.c.bf16 %v508_v58, %v507_v57 }
 0x14a   : > { %654 = vmatmul.mubr.bf16.vlgmr.msra.gmra.mrb[0].mxu0 %v511_v59 }
 0x14b   : > { %v1737_v60 = vpop.eup %1736  ;;  %663 = vmatprep.mubr.bf16.mxu0 %v2073_v24 }
 0x14c   : > { %v509_v2 = vmul.f32 %v1737_v60, %v497_v61 }
 0x14d   : > { %v1739_v63 = vpop.eup %1738 }
 0x14e   : > { %v510_v0 = vmul.f32 %v1739_v63, %v498_v62 }
 0x150   : > { %v512_v3 = vpack.c.bf16 %v510_v0, %v509_v2 }
 0x152   : > { %664 = vmatmul.mubr.bf16.gmra.mrb[4].mxu0 %v512_v3 }
 0x153   : > { %1919 = shalt.err (!%p1916_p6)  }
 0x154   : > { %s1920_s12 = scalar_lea.vmem %s2384_s25, 48  ;;  %s1924_s26 = scalar_lea.vmem %s2384_s25, 256 }
 0x155   : > { %p1921_p8 = scmp.ne.s32.totalorder %s2384_s25, %s1920_s12  ;;  %p1925_p2 = scmp.lt.s32.totalorder %s2384_s25, %s2384_s25 }
 0x156   : > { %p1926_p9 = scmp.lt.s32.totalorder %s1924_s26, %s1920_s12 }
 0x158   : > { %p1927_p5 = por %p1926_p9, %p1925_p2 }
 0x15a   : > { %p1928_p4 = pnand %p1927_p5, %p1921_p8 }
 0x15c   : > { %1931 = shalt.err (!%p1928_p4)  }
 0x15d   : > { %434 = dma.hbm_to_vmem [thread:$0]  %s423_s6, 48, %s2384_s25, [#allocation4] }
 0x15e   : > { %s438_s2 = scalar_select %p437_p11, %s2377_s29, 53 }
 0x160   : > { %s439_s8 = sadd.s32 %s438_s2, %s420_s10 }
 0x161   : > { %s1498_s21 = sshll.u32 %s439_s8, 4 }
 0x162   : > { %s441_s9 = scalar_lea.hbm %s2624_s0, %s1498_s21 }
 0x163   : > { %s1932_s4 = scalar_lea.hbm %s441_s9, 48  ;;  %p1935_p12 = scmp.lt.u32.totalorder %s441_s9, %s2624_s0 }
 0x164   : > { %p1933_p10 = scmp.ne.s32.totalorder %s441_s9, %s1932_s4  ;;  %p1936_p0 = scmp.lt.u32.totalorder %s1910_s1, %s1932_s4 }
 0x165   : > { %p1938_p13 = scmp.lt.u32.totalorder %s1932_s4, %s441_s9 }
 0x166   : > { %p1937_p1 = por %p1936_p0, %p1935_p12 }
 0x168   : > { %p1939_p7 = por %p1938_p13, %p1937_p1 }
 0x16a   : > { %p1940_p3 = pnand %p1939_p7, %p1933_p10 }
 0x16c   : > { %1943 = shalt.err (!%p1940_p3)  }
 0x16d   : > { %s1944_s6 = scalar_lea.vmem %s452_s11, 48  ;;  %p1949_p6 = scmp.lt.s32.totalorder %s452_s11, %s2384_s25 }
 0x16e   : > { %p1945_p11 = scmp.ne.s32.totalorder %s452_s11, %s1944_s6  ;;  %p1950_p8 = scmp.lt.s32.totalorder %s1924_s26, %s1944_s6 }
 0x170   : > { %p1951_p2 = por %p1950_p8, %p1949_p6 }
 0x172   : > { %p1952_p9 = pnand %p1951_p2, %p1945_p11 }
 0x174   : > { %1955 = shalt.err (!%p1952_p9)  }
 0x175   : > { %454 = dma.hbm_to_vmem [thread:$0]  %s441_s9, 48, %s452_s11, [#allocation4 + $0x1]  ;;  %v531_v1 = vlaneseq  ;;  %v529_v6 = vld [vmem:[%s2627_s3] sm:$0x3] }
 0x176   : > { %s2675_s25 = sshll.u32 %s2329_s30, 5 }
 0x177   : > { %v2413_v4 = vshrl.u32 %v531_v1, 7  ;;  %s2434_s11 = scalar_lea.vmem [#allocation11], %s2675_s25 }
 0x179   : > { %v537_v5 = vsub.s32 1, %v2413_v4  ;;  %v533_v29 = vsub.s32 0, %v2413_v4 }
 0x17b   : > { %v538_v7 = vrot.slane %v529_v6, %v537_v5  ;;  %v534_v31 = vrot.slane %v529_v6, %v533_v29 }
 0x21d   : > { %v655_v8 = vpop.f32.mrb[0].mxu0 }
 0x21e   : > { %v657_v9 = vpop.f32.mrb[1].mxu0  ;;  %v656_v35 = vadd.f32 %v655_v8, %v534_v31 }
 0x21f   : > { %v658_v10 = vadd.f32 %v657_v9, %v538_v7  ;;  %v659_v11 = vpop.f32.mrb[2].mxu0 }
 0x220   : > { %v661_v12 = vpop.f32.mrb[3].mxu0  ;;  %v660_v38 = vadd.f32 %v659_v11, %v534_v31 }
 0x221   : > { %v1515_v13 = vmul.f32 -1.442695, %v658_v10  ;;  %v662_v14 = vadd.f32 %v661_v12, %v538_v7 }
 0x223   : > { %1740 = vpow2.f32 %v1515_v13  ;;  %v1516_v15 = vmul.f32 -1.442695, %v662_v14 }
 0x225   : > { %1742 = vpow2.f32 %v1516_v15  ;;  %v665_v16 = vpop.f32.mrb[4].mxu0 }
 0x226   : > { %v667_v17 = vpop.f32.mrb[5].mxu0  ;;  %v666_v41 = vadd.f32 %v665_v16, %v534_v31 }
 0x227   : > { %v668_v18 = vadd.f32 %v667_v17, %v538_v7  ;;  %v669_v19 = vpop.f32.mrb[6].mxu0 }
 0x228   : > { %v671_v20 = vpop.f32.mrb[7].mxu0  ;;  %v670_v44 = vadd.f32 %v669_v19, %v534_v31 }
 0x229   : > { %v1517_v21 = vmul.f32 -1.442695, %v668_v18  ;;  %v672_v22 = vadd.f32 %v671_v20, %v538_v7 }
 0x22b   : > { %1744 = vpow2.f32 %v1517_v21  ;;  %v1518_v23 = vmul.f32 -1.442695, %v672_v22 }
 0x22d   : > { %v1741_v25 = vpop.eup %1740  ;;  %1746 = vpow2.f32 %v1518_v23 }
 0x22e   : > { %v686_v26 = vadd.f32 1.0, %v1741_v25 }
 0x22f   : > { %v1743_v27 = vpop.eup %1742 }
 0x230   : > { %1748 = vrcp.f32 %v686_v26  ;;  %v687_v28 = vadd.f32 1.0, %v1743_v27 }
 0x232   : > { %1750 = vrcp.f32 %v687_v28 }
 0x235   : > { %v1745_v30 = vpop.eup %1744 }
 0x236   : > { %v688_v32 = vadd.f32 1.0, %v1745_v30 }
 0x237   : > { %v1747_v33 = vpop.eup %1746 }
 0x238   : > { %1752 = vrcp.f32 %v688_v32  ;;  %v689_v34 = vadd.f32 1.0, %v1747_v33 }
 0x23a   : > { %v1749_v36 = vpop.eup %1748  ;;  %1754 = vrcp.f32 %v689_v34 }
 0x23b   : > { %v2424_v37 = vmul.f32 %v1749_v36, %v656_v35 }
 0x23c   : > { %v1751_v39 = vpop.eup %1750 }
 0x23d   : > { %v2426_v40 = vmul.f32 %v1751_v39, %v660_v38 }
 0x242   : > { %v1753_v42 = vpop.eup %1752 }
 0x243   : > { %v2428_v43 = vmul.f32 %v1753_v42, %v666_v41 }
 0x244   : > { %v1755_v45 = vpop.eup %1754 }
 0x245   : > { %v2430_v46 = vmul.f32 %v1755_v45, %v670_v44 }
 0x246   : > { %2024 = dma.done.wait [#allocation4], 48 }
 0x247   : > { %2025 = vsyncadd [#allocation4], 4294967248 }
 0x248   : > { %2026 = dma.done.wait [#allocation4 + $0x1], 48 }
 0x249   : > { %2027 = vsyncadd [#allocation4 + $0x1], 4294967248  ;;  %876 = vmatprep.mubr.bf16.mxu1 %v2073_v24  ;;  %v707_v47 = vld [vmem:[#allocation2] sm:$0xff]  ;;  %v708_v48 = vld [vmem:[#allocation2 + $0x8] sm:$0xff]  ;;  %s902_s22 = sadd.s32 3, %s2377_s29  ;;  %p901_p5 = scmp.eq.s32.totalorder %s2046_s16, 0 }
 0x24a   : > { %709 = vadd.xlane.f32.xlu0 %v707_v47  ;;  %v713_v49 = vmul.f32 %v707_v47, %v707_v47  ;;  %v1756_v50 = vld [vmem:[#allocation8 + $0x4] ss:$8 sps:$4 sm:$0xff]   ;;  %v1758_v51 = vld [vmem:[#allocation8] ss:$8 sps:$4 sm:$0xff]   ;;  %v1759_v52 = vld [vmem:[#allocation8 + $0x14] ss:$8 sps:$4 sm:$0xff]   ;;  %v714_v53 = vmul.f32 %v708_v48, %v708_v48 }
 0x24b   : > { %844 = vmatprep.subr.bf16.mxu1 %v1756_v50  ;;  %v1761_v54 = vld [vmem:[#allocation8 + $0x10] ss:$8 sps:$4 sm:$0xff]   ;;  %v1762_v55 = vld [vmem:[#allocation8 + $0x24] ss:$8 sps:$4 sm:$0xff]   ;;  %v1764_v56 = vld [vmem:[#allocation8 + $0x20] ss:$8 sps:$4 sm:$0xff]  }
 0x24c   : > { %715 = vadd.xlane.f32.xlu1 %v713_v49  ;;  %845 = vmatpush1.bf16.msra.mxu1 %v1758_v51  ;;  %v1765_v24 = vld [vmem:[#allocation8 + $0x34] ss:$8 sps:$4 sm:$0xff]   ;;  %v1767_v57 = vld [vmem:[#allocation8 + $0x30] ss:$8 sps:$4 sm:$0xff]   ;;  %v1768_v58 = vld [vmem:[#allocation8 + $0x44] ss:$8 sps:$4 sm:$0xff]  }
 0x24d   : > { %846 = vmatprep.subr.bf16.mxu1 %v1759_v52  ;;  %v1770_v59 = vld [vmem:[#allocation8 + $0x40] ss:$8 sps:$4 sm:$0xff]   ;;  %v1771_v60 = vld [vmem:[#allocation8 + $0x54] ss:$8 sps:$4 sm:$0xff]   ;;  %v1773_v61 = vld [vmem:[#allocation8 + $0x50] ss:$8 sps:$4 sm:$0xff]  }
 0x24e   : > { %711 = vadd.xlane.f32.xlu0 %v708_v48  ;;  %v1774_v62 = vld [vmem:[#allocation8 + $0x64] ss:$8 sps:$4 sm:$0xff]   ;;  %v1776_v63 = vld [vmem:[#allocation8 + $0x60] ss:$8 sps:$4 sm:$0xff]   ;;  %v1777_v2 = vld [vmem:[#allocation8 + $0x74] ss:$8 sps:$4 sm:$0xff]  }
 0x24f   : > { %v1779_v0 = vld [vmem:[#allocation8 + $0x70] ss:$8 sps:$4 sm:$0xff]   ;;  %p903_p4 = scmp.gt.s32.totalorder %s902_s22, 56  ;;  %v752_v26 = vld [vmem:[%s2627_s3] sm:$0x3] }
 0x250   : > { %717 = vadd.xlane.f32.xlu1 %v714_v53  ;;  %847 = vmatpush1.bf16.msra.mxu1 %v1761_v54  ;;  %v761_v27 = vrot.slane %v752_v26, %v537_v5  ;;  %v757_v44 = vrot.slane %v752_v26, %v533_v29 }
 0x251   : > { %848 = vmatprep.subr.bf16.mxu1 %v1762_v55  ;;  %p2439_p10 = por %p903_p4, %p901_p5 }
 0x252   : > { %v913_v51 = vstv (%p2439_p10), %s2370_s13  ;;  %v910_v52 = vadd.s32 (%p2439_p10), 8, %v2413_v4  ;;  %v911_v53 = vadd.s32 (%p2439_p10), 16, %v2413_v4  ;;  %v912_v54 = vadd.s32 (%p2439_p10), 24, %v2413_v4 }
 0x253   : > { %v914_v29 = vadd.s32 (%p2439_p10), %v913_v51, %v2413_v4  ;;  %v938_v55 = vstv (%p2439_p10), %s2373_s28  ;;  %vm952_vm0 = vcmask (%p2439_p10), 1041408  }
 0x254   : > { %849 = vmatpush1.bf16.msra.mxu1 %v1764_v56  ;;  %v945_v56 = vstv (%p2439_p10), %s2377_s29 }
 0x255   : > { %850 = vmatprep.subr.bf16.mxu1 %v1765_v24  ;;  %v915_v24 = vadd.s32 (%p2439_p10), %v913_v51, %v910_v52  ;;  %vm918_vm1 = vcmp.lt.s32.totalorder (%p2439_p10), %v914_v29, 56 }
 0x257   : > { %vm919_vm2 = vcmp.lt.s32.totalorder (%p2439_p10), %v915_v24, 56 }
 0x258   : > { %851 = vmatpush1.bf16.msra.mxu1 %v1767_v57  ;;  %v916_v57 = vadd.s32 (%p2439_p10), %v913_v51, %v911_v53 }
 0x259   : > { %852 = vmatprep.subr.bf16.mxu1 %v1768_v58  ;;  %v917_v58 = vadd.s32 (%p2439_p10), %v913_v51, %v912_v54 }
 0x25a   : > { %vm920_vm3 = vcmp.lt.s32.totalorder (%p2439_p10), %v916_v57, 56 }
 0x25b   : > { %vm921_vm4 = vcmp.lt.s32.totalorder (%p2439_p10), %v917_v58, 56 }
 0x25c   : > { %853 = vmatpush1.bf16.msra.mxu1 %v1770_v59  ;;  %v939_v59 = vadd.s32 (%p2439_p10), %v938_v55, %v2413_v4 }
 0x25d   : > { %854 = vmatprep.subr.bf16.mxu1 %v1771_v60  ;;  %v946_v60 = vadd.s32 (%p2439_p10), %v945_v56, %v2413_v4 }
 0x25e   : > { %vm940_vm5 = vcmp.ge.s32.totalorder (%p2439_p10), %v939_v59, 0 }
 0x25f   : > { %vm947_vm6 = vcmp.lt.s32.totalorder (%p2439_p10), %v946_v60, 56 }
 0x260   : > { %855 = vmatpush1.bf16.msra.mxu1 %v1773_v61 }
 0x261   : > { %856 = vmatprep.subr.bf16.mxu1 %v1774_v62 }
 0x264   : > { %857 = vmatpush1.bf16.msra.mxu1 %v1776_v63  ;;  %v930_v63 = vsel (%p2439_p10), %vm918_vm1, %v2424_v37, 0.0 }
 0x265   : > { %858 = vmatprep.subr.bf16.mxu1 %v1777_v2  ;;  %934 = vst [vmem:[#allocation3 + $0x8] sm:$0xff] (%p2439_p10), %v930_v63  ;;  %v931_v2 = vsel (%p2439_p10), %vm919_vm2, %v2426_v40, 0.0 }
 0x266   : > { %935 = vst [vmem:[#allocation3 + $0x10] sm:$0xff] (%p2439_p10), %v931_v2 }
 0x268   : > { %859 = vmatpush1.bf16.msra.mxu1 %v1779_v0  ;;  %v932_v0 = vsel (%p2439_p10), %vm920_vm3, %v2428_v43, 0.0 }
 0x269   : > { %936 = vst [vmem:[#allocation3 + $0x18] sm:$0xff] (%p2439_p10), %v932_v0 }
 0x2d7   : > { %v710_v3 = vpop.xlane.xlu0 %709 }
 0x2d8   : > { %v719_v1 = vmul.f32 0.0078125, %v710_v3  ;;  %v933_v3 = vsel (%p2439_p10), %vm921_vm4, %v2430_v46, 0.0 }
 0x2d9   : > { %v716_v6 = vpop.xlane.xlu1 %715  ;;  %937 = vst [vmem:[#allocation3 + $0x20] sm:$0xff] (%p2439_p10), %v933_v3 }
 0x2da   : > { %v723_v7 = vmul.f32 %v719_v1, %v719_v1  ;;  %v721_v8 = vmul.f32 0.0078125, %v716_v6  ;;  %v727_v19 = vsub.f32 %v707_v47, %v719_v1 }
 0x2db   : > { %v712_v9 = vpop.xlane.xlu0 %711 }
 0x2dc   : > { %v725_v10 = vsub.f32 %v721_v8, %v723_v7  ;;  %v720_v11 = vmul.f32 0.0078125, %v712_v9 }
 0x2dd   : > { %v718_v12 = vpop.xlane.xlu1 %717 }
 0x2de   : > { %v729_v13 = vadd.f32 1e-05, %v725_v10  ;;  %v724_v14 = vmul.f32 %v720_v11, %v720_v11  ;;  %v722_v15 = vmul.f32 0.0078125, %v718_v12  ;;  %v728_v20 = vsub.f32 %v708_v48, %v720_v11 }
 0x2e0   : > { %v726_v16 = vsub.f32 %v722_v15, %v724_v14  ;;  %1780 = vrsqrt.f32 %v729_v13 }
 0x2e2   : > { %v730_v17 = vadd.f32 1e-05, %v726_v16 }
 0x2e4   : > { %1782 = vrsqrt.f32 %v730_v17 }
 0x2ea   : > { %v1781_v18 = vpop.eup %1780 }
 0x2eb   : > { %v733_v22 = vmul.f32 %v1781_v18, %v727_v19 }
 0x2ee   : > { %v1783_v21 = vpop.eup %1782 }
 0x2ef   : > { %v734_v23 = vmul.f32 %v1783_v21, %v728_v20 }
 0x2f1   : > { %v735_v25 = vpack.c.bf16 %v734_v23, %v733_v22 }
 0x2f3   : > { %877 = vmatmul.mubr.bf16.vlgmr.msra.gmra.mrb[0].mxu1 %v735_v25 }
 0x3c6   : > { %v878_v28 = vpop.f32.mrb[0].mxu1 }
 0x3c7   : > { %v880_v30 = vpop.f32.mrb[1].mxu1  ;;  %v879_v5 = vadd.f32 %v878_v28, %v757_v44 }
 0x3c8   : > { %v881_v31 = vadd.f32 %v880_v30, %v761_v27  ;;  %v882_v32 = vpop.f32.mrb[2].mxu1 }
 0x3c9   : > { %v884_v33 = vpop.f32.mrb[3].mxu1  ;;  %v883_v48 = vadd.f32 %v882_v32, %v757_v44 }
 0x3ca   : > { %v1535_v34 = vmul.f32 -1.442695, %v881_v31  ;;  %v885_v35 = vadd.f32 %v884_v33, %v761_v27 }
 0x3cc   : > { %1784 = vpow2.f32 %v1535_v34  ;;  %v1536_v36 = vmul.f32 -1.442695, %v885_v35 }
 0x3ce   : > { %1786 = vpow2.f32 %v1536_v36 }
 0x3d6   : > { %v1785_v38 = vpop.eup %1784 }
 0x3d7   : > { %v893_v39 = vadd.f32 1.0, %v1785_v38 }
 0x3d8   : > { %v1787_v41 = vpop.eup %1786 }
 0x3d9   : > { %1788 = vrcp.f32 %v893_v39  ;;  %v894_v42 = vadd.f32 1.0, %v1787_v41 }
 0x3db   : > { %1790 = vrcp.f32 %v894_v42 }
 0x3e0   : > { %907 = sbr.rel (!%p2439_p10) target bundleno = 1005 (0x3ed), region = 80 }
 0x3e3   : > { %v1789_v45 = vpop.eup %1788 }
 0x3e4   : > { %v899_v47 = vmul.f32 %v1789_v45, %v879_v5 }
 0x3e5   : > { %v1791_v49 = vpop.eup %1790 }
 0x3e6   : > { %v900_v50 = vmul.f32 %v1791_v49, %v883_v48  ;;  %v953_v61 = vrot.slane (%p2439_p10), %v899_v47, 6  ;;  %v943_v1 = vsel (%p2439_p10), %vm940_vm5, %v899_v47, 0.0 }
 0x3e7   : > { %944 = vst [vmem:[#allocation3 + $0x5] sm:$0x7] %v943_v1 }
 0x3e8   : > { %v954_v62 = vrot.slane %v900_v50, 6 }
 0x3ea   : > { %v955_v4 = vsel %vm952_vm0, %v953_v61, %v954_v62 }
 0x3eb   : > { %v957_v6 = vsel %vm947_vm6, %v955_v4, 0.0 }
 0x3ec   : > { %958 = vst [vmem:[#allocation3 + $0x28] sm:$0x7] %v957_v6 }
 0x3ed PF: > { %961 = sbr.rel (%p2439_p10) target bundleno = 1012 (0x3f4), region = 84  ;;  %962 = vst [vmem:[#allocation3 + $0x8] sm:$0xff] (!%p2439_p10), %v2424_v37  ;;  %963 = vst [vmem:[#allocation3 + $0x10] sm:$0xff] (!%p2439_p10), %v2426_v40 }
 0x3ee   : > { %964 = vst [vmem:[#allocation3 + $0x18] sm:$0xff] (!%p2439_p10), %v2428_v43  ;;  %965 = vst [vmem:[#allocation3 + $0x20] sm:$0xff] (!%p2439_p10), %v2430_v46 }
 0x3ef   : > { %966 = vst [vmem:[#allocation3 + $0x5] sm:$0x7] (!%p2439_p10), %v899_v47  ;;  %967 = vst [vmem:[#allocation3 + $0x22] sm:$0xc0] (!%p2439_p10), %v899_v47 }
 0x3f0   : > { %968 = vst [vmem:[#allocation3 + $0x2a] sm:$0x1] (!%p2439_p10), %v900_v50 }
 0x3f4 PF: > { %v2475_v7 = vld [vmem:[%s2629_s5] ss:$0 sm:$0xff]  ;;  %s2677_s21 = sld [smem:[#allocation31_spill]]  ;;  %v1028_v31 = vld [vmem:[#allocation3 + $0x8] sm:$0xff]  ;;  %s2678_s13 = sld [smem:[#allocation32_spill]] }
 0x3f5   : > { %v979_v8 = vld [vmem:[#allocation3 + $0x15] sm:$0xff]  ;;  %v980_v32 = vld [vmem:[#allocation3 + $0x1d] sm:$0xff]  ;;  %v1045_v45 = vld [vmem:[#allocation3 + $0x9] sm:$0xff]  ;;  %s2679_s8 = sld [smem:[#allocation33_spill]]  ;;  %s2680_s9 = sld [smem:[#allocation35_spill]] }
 0x3f6   : > { %v996_v40 = vld [vmem:[#allocation3 + $0x16] sm:$0xff]  ;;  %v977_v20 = vld [vmem:[#allocation3 + $0x5] sm:$0xff]  ;;  %v978_v48 = vld [vmem:[#allocation3 + $0xd] sm:$0xff]  ;;  %s1325_s4 = scalar_lea.sflag [#allocation7], %s2329_s30  ;;  %s2681_s7 = sld [smem:[#allocation26_spill]] }
 0x3f7   : > { %v1013_v46 = vld [vmem:[#allocation3 + $0x17] sm:$0xff]  ;;  %v994_v21 = vld [vmem:[#allocation3 + $0x6] sm:$0xff]  ;;  %v995_v54 = vld [vmem:[#allocation3 + $0xe] sm:$0xff] }
 0x3f8   : > { %v1030_v12 = vld [vmem:[#allocation3 + $0x18] sm:$0xff]  ;;  %v1011_v22 = vld [vmem:[#allocation3 + $0x7] sm:$0xff]  ;;  %v1012_v29 = vld [vmem:[#allocation3 + $0xf] sm:$0xff] }
 0x3f9   : > { %v1047_v16 = vld [vmem:[#allocation3 + $0x19] sm:$0xff]  ;;  %v1062_v51 = vld [vmem:[#allocation3 + $0xa] sm:$0xff]  ;;  %v1048_v57 = vld [vmem:[#allocation3 + $0x21] sm:$0xff] }
 0x3fa   : > { %v1538_v37 = vld [vmem:[%s2677_s21] ss:$0 sm:$0xff]  ;;  %v1539_v43 = vld [vmem:[%s2677_s21 + $0x1] ss:$0 sm:$0xff]  ;;  %v1540_v11 = vld [vmem:[%s2677_s21 + $0x2] ss:$0 sm:$0xff] }
 0x3fb   : > { %v988_v9 = vmul.f32 %v1538_v37, %v979_v8  ;;  %v1005_v10 = vmul.f32 %v1539_v43, %v996_v40  ;;  %v1541_v13 = vld [vmem:[%s2677_s21 + $0x3] ss:$0 sm:$0xff]  ;;  %v1022_v15 = vmul.f32 %v1540_v11, %v1013_v46  ;;  %v2493_v17 = vld [vmem:[%s2677_s21 + $0x4] ss:$0 sm:$0xff]  ;;  %v1064_v23 = vld [vmem:[#allocation3 + $0x1a] sm:$0xff]  ;;  %v986_v26 = vmul.f32 %v1538_v37, %v977_v20 }
 0x3fc   : > { %v1039_v19 = vmul.f32 %v1541_v13, %v1030_v12  ;;  %v2498_v25 = vld [vmem:[%s2677_s21 + $0x5] ss:$0 sm:$0xff]  ;;  %v1003_v27 = vmul.f32 %v1539_v43, %v994_v21  ;;  %v1056_v30 = vmul.f32 %v2493_v17, %v1047_v16  ;;  %v997_v33 = vld [vmem:[#allocation3 + $0x1e] sm:$0xff]  ;;  %v1544_v35 = vld [vmem:[%s2677_s21 + $0x6] ss:$0 sm:$0xff]  ;;  %v1020_v38 = vmul.f32 %v1540_v11, %v1011_v22  ;;  %p2682_p12 = scmp.ne.s32.totalorder %s2681_s7, 0 }
 0x3fd   : > { %v992_v14 = vadd.f32 %v2475_v7, %v988_v9  ;;  %v1081_v34 = vld [vmem:[#allocation3 + $0x1b] sm:$0xff]  ;;  %v990_v36 = vadd.f32 %v2475_v7, %v986_v26  ;;  %v989_v39 = vmul.f32 %v1538_v37, %v980_v32  ;;  %v1006_v41 = vmul.f32 %v1539_v43, %v997_v33  ;;  %v1079_v24 = vld [vmem:[#allocation3 + $0xb] sm:$0xff]  ;;  %v1082_v4 = vld [vmem:[#allocation3 + $0x23] sm:$0xff]  ;;  %s1561_s24 = sshll.u32 (%p2682_p12), %s2046_s16, 2 }
 0x3fe   : > { %v1014_v42 = vld [vmem:[#allocation3 + $0x1f] sm:$0xff]  ;;  %v1073_v5 = vmul.f32 %v2498_v25, %v1064_v23  ;;  %v1037_v50 = vmul.f32 %v1541_v13, %v1028_v31  ;;  %v1090_v56 = vmul.f32 %v1544_v35, %v1081_v34  ;;  %v987_v59 = vmul.f32 %v1538_v37, %v978_v48  ;;  %v1029_v61 = vld [vmem:[#allocation3 + $0x10] sm:$0xff]  ;;  %s1333_s6 = ssub.s32 (%p2682_p12), 7, %s1561_s24 }
 0x3ff   : > { %v1009_v18 = vadd.f32 %v1005_v10, %v992_v14  ;;  %v1031_v47 = vld [vmem:[#allocation3 + $0x20] sm:$0xff]  ;;  %v1007_v49 = vadd.f32 %v1003_v27, %v990_v36  ;;  %v993_v52 = vadd.f32 %v2475_v7, %v989_v39  ;;  %v1023_v53 = vmul.f32 %v1540_v11, %v1014_v42  ;;  %v1046_v3 = vld [vmem:[#allocation3 + $0x11] sm:$0xff]  ;;  %v1795_v42 = vld [vmem:[#allocation10 + $0x18] sm:$0xff]   ;;  %p1334_p0 = scmp.lt.s32.totalorder (%p2682_p12), %s1333_s6, 4 }
 0x400   : > { %v1065_v58 = vld [vmem:[#allocation3 + $0x22] sm:$0xff]  ;;  %v1004_v60 = vmul.f32 %v1539_v43, %v995_v54  ;;  %v1054_v63 = vmul.f32 %v2493_v17, %v1045_v45  ;;  %v1040_v0 = vmul.f32 %v1541_v13, %v1031_v47  ;;  %v991_v6 = vadd.f32 %v2475_v7, %v987_v59  ;;  %v1063_v37 = vld [vmem:[#allocation3 + $0x12] sm:$0xff] }
 0x401   : > { %v1026_v28 = vadd.f32 %v1022_v15, %v1009_v18  ;;  %v1024_v62 = vadd.f32 %v1020_v38, %v1007_v49  ;;  %v1010_v2 = vadd.f32 %v1006_v41, %v993_v52  ;;  %v1021_v8 = vmul.f32 %v1540_v11, %v1012_v29  ;;  %v1080_v23 = vld [vmem:[#allocation3 + $0x13] sm:$0xff]  ;;  %v1794_v41 = vld [vmem:[#allocation10 + $0x10] sm:$0xff]   ;;  %v1799_v47 = vld [vmem:[#allocation10 + $0x38] sm:$0xff]  }
 0x402   : > { %v1071_v40 = vmul.f32 %v2498_v25, %v1062_v51  ;;  %v1057_v10 = vmul.f32 %v2493_v17, %v1048_v57  ;;  %v1008_v12 = vadd.f32 %v1004_v60, %v991_v6  ;;  %v1038_v14 = vmul.f32 %v1541_v13, %v1029_v61  ;;  %v1792_v38 = vld [vmem:[#allocation10] sm:$0xff]   ;;  %v1793_v39 = vld [vmem:[#allocation10 + $0x8] sm:$0xff]   ;;  %v1798_v45 = vld [vmem:[#allocation10 + $0x30] sm:$0xff]  }
 0x403   : > { %v1043_v44 = vadd.f32 %v1039_v19, %v1026_v28  ;;  %v1041_v9 = vadd.f32 %v1037_v50, %v1024_v62  ;;  %v1027_v46 = vadd.f32 %v1023_v53, %v1010_v2  ;;  %v1088_v16 = vmul.f32 %v1544_v35, %v1079_v24  ;;  %1583 = vmatprep.subr.bf16.mxu0 %v1792_v38 }
 0x404   : > { %v1074_v19 = vmul.f32 %v2498_v25, %v1065_v58  ;;  %v1025_v7 = vadd.f32 %v1021_v8, %v1008_v12  ;;  %v1055_v11 = vmul.f32 %v2493_v17, %v1046_v3  ;;  %v1091_v22 = vmul.f32 %v1544_v35, %v1082_v4  ;;  %1584 = vmatpush3.bf16.msra.mxu0 %v1792_v38  ;;  %v1545_v12 = vld [vmem:[%s2678_s13] ss:$0 sm:$0xff] }
 0x405   : > { %v1060_v55 = vadd.f32 %v1056_v30, %v1043_v44  ;;  %v1058_v15 = vadd.f32 %v1054_v63, %v1041_v9  ;;  %v1044_v18 = vadd.f32 %v1040_v0, %v1027_v46  ;;  %v1072_v27 = vmul.f32 %v2498_v25, %v1063_v37  ;;  %1585 = vmatprep.subr.bf16.mxu0 %v1793_v39  ;;  %v1796_v44 = vld [vmem:[#allocation10 + $0x20] sm:$0xff]  }
 0x406   : > { %v1042_v26 = vadd.f32 %v1038_v14, %v1025_v7  ;;  %v1089_v31 = vmul.f32 %v1544_v35, %v1080_v23 }
 0x407   : > { %v1077_v1 = vadd.f32 %v1073_v5, %v1060_v55  ;;  %v1075_v20 = vadd.f32 %v1071_v40, %v1058_v15  ;;  %v1061_v21 = vadd.f32 %v1057_v10, %v1044_v18  ;;  %v1797_v5 = vld [vmem:[#allocation10 + $0x28] sm:$0xff]   ;;  %v1546_v18 = vld [vmem:[%s2679_s8] ss:$0 sm:$0xff] }
 0x408   : > { %v1059_v30 = vadd.f32 %v1055_v11, %v1042_v26  ;;  %1586 = vmatpush3.bf16.msra.mxu0 %v1793_v39 }
 0x409   : > { %v2511_v43 = vadd.f32 %v1090_v56, %v1077_v1  ;;  %v2517_v28 = vadd.f32 %v1088_v16, %v1075_v20  ;;  %v1078_v13 = vadd.f32 %v1074_v19, %v1061_v21  ;;  %1587 = vmatprep.subr.bf16.mxu0 %v1794_v41 }
 0x40a   : > { %v1076_v33 = vadd.f32 %v1072_v27, %v1059_v30 }
 0x40b   : > { %1100 = vadd.xlane.f32.xlu1 %v2511_v43  ;;  %1096 = vadd.xlane.f32.xlu0 %v2517_v28  ;;  %v2520_v32 = vadd.f32 %v1091_v22, %v1078_v13  ;;  %v1104_v25 = vmul.f32 %v2517_v28, %v2517_v28  ;;  %v1106_v36 = vmul.f32 %v2511_v43, %v2511_v43 }
 0x40c   : > { %v2523_v17 = vadd.f32 %v1089_v31, %v1076_v33  ;;  %1588 = vmatpush3.bf16.msra.mxu0 %v1794_v41 }
 0x40d   : > { %v1107_v35 = vmul.f32 %v2520_v32, %v2520_v32  ;;  %1589 = vmatprep.subr.bf16.mxu0 %v1795_v42 }
 0x40e   : > { %v1105_v34 = vmul.f32 %v2523_v17, %v2523_v17 }
 0x40f   : > { %1102 = vadd.xlane.f32.xlu1 %v2520_v32  ;;  %1098 = vadd.xlane.f32.xlu0 %v2523_v17 }
 0x410   : > { %1590 = vmatpush3.bf16.msra.mxu0 %v1795_v42 }
 0x411   : > { %1591 = vmatprep.subr.bf16.mxu0 %v1796_v44 }
 0x413   : > { %1110 = vadd.xlane.f32.xlu1 %v1105_v34  ;;  %1108 = vadd.xlane.f32.xlu0 %v1104_v25 }
 0x414   : > { %1592 = vmatpush3.bf16.msra.mxu0 %v1796_v44 }
 0x415   : > { %1593 = vmatprep.subr.bf16.mxu0 %v1797_v5 }
 0x417   : > { %1114 = vadd.xlane.f32.xlu1 %v1107_v35  ;;  %1112 = vadd.xlane.f32.xlu0 %v1106_v36 }
 0x418   : > { %1594 = vmatpush3.bf16.msra.mxu0 %v1797_v5 }
 0x419   : > { %1595 = vmatprep.subr.bf16.mxu0 %v1798_v45 }
 0x41c   : > { %1596 = vmatpush3.bf16.msra.mxu0 %v1798_v45 }
 0x41d   : > { %1597 = vmatprep.subr.bf16.mxu0 %v1799_v47 }
 0x420   : > { %1598 = vmatpush3.bf16.msra.mxu0 %v1799_v47 }
 0x498   : > { %v1101_v48 = vpop.xlane.xlu1 %1100  ;;  %v1097_v49 = vpop.xlane.xlu0 %1096 }
 0x499   : > { %v1116_v52 = vmul.f32 0.0078125, %v1097_v49  ;;  %v1118_v24 = vmul.f32 0.0078125, %v1101_v48 }
 0x49b   : > { %v1124_v58 = vmul.f32 %v1116_v52, %v1116_v52  ;;  %v1126_v3 = vmul.f32 %v1118_v24, %v1118_v24  ;;  %v1132_v14 = vsub.f32 %v2517_v28, %v1116_v52  ;;  %v1134_v21 = vsub.f32 %v2511_v43, %v1118_v24 }
 0x49c   : > { %v1103_v50 = vpop.xlane.xlu1 %1102  ;;  %v1099_v51 = vpop.xlane.xlu0 %1098 }
 0x49d   : > { %v1117_v53 = vmul.f32 0.0078125, %v1099_v51  ;;  %v1119_v29 = vmul.f32 0.0078125, %v1103_v50 }
 0x49f   : > { %v1125_v55 = vmul.f32 %v1117_v53, %v1117_v53  ;;  %v1127_v62 = vmul.f32 %v1119_v29, %v1119_v29  ;;  %v1133_v10 = vsub.f32 %v2523_v17, %v1117_v53  ;;  %v1135_v19 = vsub.f32 %v2520_v32, %v1119_v29 }
 0x4a0   : > { %v1111_v54 = vpop.xlane.xlu1 %1110  ;;  %v1109_v57 = vpop.xlane.xlu0 %1108 }
 0x4a1   : > { %v1121_v56 = vmul.f32 0.0078125, %v1111_v54  ;;  %v1120_v60 = vmul.f32 0.0078125, %v1109_v57 }
 0x4a3   : > { %v1129_v59 = vsub.f32 %v1121_v56, %v1125_v55  ;;  %v1128_v2 = vsub.f32 %v1120_v60, %v1124_v58  ;;  %v1551_v55 = vld [vmem:[%s2680_s9] ss:$0 sm:$0xff] }
 0x4a4   : > { %v1115_v61 = vpop.xlane.xlu1 %1114  ;;  %v1113_v1 = vpop.xlane.xlu0 %1112 }
 0x4a5   : > { %v1137_v63 = vadd.f32 1e-05, %v1129_v59  ;;  %v1123_v0 = vmul.f32 0.0078125, %v1115_v61  ;;  %v1136_v4 = vadd.f32 1e-05, %v1128_v2  ;;  %v1122_v8 = vmul.f32 0.0078125, %v1113_v1 }
 0x4a7   : > { %1800 = vrsqrt.f32 %v1137_v63  ;;  %v1131_v6 = vsub.f32 %v1123_v0, %v1127_v62  ;;  %v1130_v40 = vsub.f32 %v1122_v8, %v1126_v3 }
 0x4a8   : > { %1802 = vrsqrt.f32 %v1136_v4 }
 0x4a9   : > { %v1139_v9 = vadd.f32 1e-05, %v1131_v6  ;;  %v1138_v46 = vadd.f32 1e-05, %v1130_v40 }
 0x4ab   : > { %1804 = vrsqrt.f32 %v1139_v9 }
 0x4ac   : > { %1806 = vrsqrt.f32 %v1138_v46 }
 0x4b1   : > { %v1801_v37 = vpop.eup %1800 }
 0x4b2   : > { %v1145_v15 = vmul.f32 %v1801_v37, %v1133_v10  ;;  %v1803_v16 = vpop.eup %1802 }
 0x4b3   : > { %v1144_v7 = vmul.f32 %v1803_v16, %v1132_v14 }
 0x4b4   : > { %v1156_v11 = vmul.f32 %v1545_v12, %v1145_v15 }
 0x4b5   : > { %v1805_v20 = vpop.eup %1804  ;;  %v1155_v22 = vmul.f32 %v1545_v12, %v1144_v7 }
 0x4b6   : > { %v1167_v23 = vadd.f32 %v1546_v18, %v1156_v11  ;;  %v1147_v26 = vmul.f32 %v1805_v20, %v1135_v19  ;;  %v1807_v27 = vpop.eup %1806 }
 0x4b7   : > { %v1166_v13 = vadd.f32 %v1546_v18, %v1155_v22  ;;  %v1146_v28 = vmul.f32 %v1807_v27, %v1134_v21 }
 0x4b8   : > { %v1548_v30 = vmul.f32 -1.442695, %v1167_v23  ;;  %v1158_v31 = vmul.f32 %v1545_v12, %v1147_v26 }
 0x4b9   : > { %v1547_v33 = vmul.f32 -1.442695, %v1166_v13  ;;  %v1157_v17 = vmul.f32 %v1545_v12, %v1146_v28 }
 0x4ba   : > { %1808 = vpow2.f32 %v1548_v30  ;;  %v1169_v34 = vadd.f32 %v1546_v18, %v1158_v31 }
 0x4bb   : > { %1810 = vpow2.f32 %v1547_v33  ;;  %v1168_v25 = vadd.f32 %v1546_v18, %v1157_v17 }
 0x4bc   : > { %v1550_v32 = vmul.f32 -1.442695, %v1169_v34 }
 0x4bd   : > { %v1549_v35 = vmul.f32 -1.442695, %v1168_v25 }
 0x4be   : > { %1812 = vpow2.f32 %v1550_v32 }
 0x4bf   : > { %1814 = vpow2.f32 %v1549_v35 }
 0x4c4   : > { %v1809_v36 = vpop.eup %1808 }
 0x4c5   : > { %v1183_v43 = vadd.f32 1.0, %v1809_v36  ;;  %v1811_v38 = vpop.eup %1810 }
 0x4c6   : > { %v1182_v39 = vadd.f32 1.0, %v1811_v38 }
 0x4c7   : > { %1816 = vrcp.f32 %v1183_v43 }
 0x4c8   : > { %v1813_v41 = vpop.eup %1812  ;;  %1818 = vrcp.f32 %v1182_v39 }
 0x4c9   : > { %v1185_v42 = vadd.f32 1.0, %v1813_v41  ;;  %v1815_v44 = vpop.eup %1814 }
 0x4ca   : > { %v1184_v5 = vadd.f32 1.0, %v1815_v44 }
 0x4cb   : > { %1820 = vrcp.f32 %v1185_v42 }
 0x4cc   : > { %1822 = vrcp.f32 %v1184_v5 }
 0x4d1   : > { %v1817_v45 = vpop.eup %1816 }
 0x4d2   : > { %v1195_v47 = vmul.f32 %v1817_v45, %v1167_v23  ;;  %v1819_v48 = vpop.eup %1818 }
 0x4d3   : > { %v1194_v49 = vmul.f32 %v1819_v48, %v1166_v13 }
 0x4d5   : > { %v1821_v50 = vpop.eup %1820  ;;  %v1198_v51 = vpack.c.bf16 %v1195_v47, %v1194_v49 }
 0x4d6   : > { %v1197_v52 = vmul.f32 %v1821_v50, %v1169_v34  ;;  %v1823_v53 = vpop.eup %1822 }
 0x4d7   : > { %1599 = vmatprep.mubr.bf16.mxu0 %v1198_v51  ;;  %v1196_v54 = vmul.f32 %v1823_v53, %v1168_v25 }
 0x4d9   : > { %v1199_v29 = vpack.c.bf16 %v1197_v52, %v1196_v54 }
 0x4db   : > { %1600 = vmatmul.mubr.bf16.vlgmr.msra.gmra.mrb[8].mxu0 %v1199_v29 }
 0x5ae   : > { %v1601_v56 = vpop.f32.mrb[8].mxu0  ;;  %1331 = sbr.rel (!%p2682_p12) target bundleno = 1492 (0x5d4), region = 88 }
 0x5af   : > { %v1314_v24 = vadd.f32 %v1601_v56, %v1551_v55  ;;  %v1305_v57 = vpop.f32.mrb[9].mxu0 }
 0x5b0   : > { %v1306_v58 = vadd.f32 %v1551_v55, %v1305_v57  ;;  %v1602_v59 = vpop.f32.mrb[10].mxu0 }
 0x5b1   : > { %1322 = vst [vmem:[%s2434_s11 + $0x10] sm:$0xff] %v1314_v24  ;;  %v1317_v60 = vadd.f32 %v1602_v59, %v1551_v55  ;;  %v1308_v61 = vpop.f32.mrb[11].mxu0 }
 0x5b2   : > { %1320 = vst [vmem:[%s2434_s11] sm:$0xff] %v1306_v58  ;;  %v1309_v62 = vadd.f32 %v1551_v55, %v1308_v61 }
 0x5b3   : > { %1323 = vst [vmem:[%s2434_s11 + $0x18] sm:$0xff] %v1317_v60 }
 0x5b4   : > { %1321 = vst [vmem:[%s2434_s11 + $0x8] sm:$0xff] %v1309_v62 }
 0x5b5   : > { %s2707_s6 = smov (!%p1334_p0, %s1333_s6), 4 }
 0x5b6   : > { %s2555_s1 = sshll.u32 %s2707_s6, 7 }
 0x5b7   : > { %s1338_s10 = ssub.s32 512, %s2555_s1 }
 0x5b8   : > { %1339 = vsyncadd %s1325_s4, %s1338_s10  ;;  %p1563_p1 = scmp.ne.s32.totalorder %s2555_s1, 0  ;;  %s1604_s25 = smul.u32 7, %s2050_s17 }
 0x5b9   : > { %s1346_s22 = sshll.u32 %s2434_s11, 4  ;;  %s2683_s13 = sld [smem:[#allocation36_spill]]  ;;  %s2563_s22 = int_to_ptr.vmem [resolvable:$true] %s1346_s22 }
 0x5ba   : > { %s1342_s12 = sadd.s32 %s1604_s25, %s1561_s24  ;;  %s1956_s8 = scalar_lea.vmem %s2563_s22, %s2555_s1 }
 0x5bb   : > { %s1564_s16 = sshll.u32 %s1342_s12, 7  ;;  %p1957_p13 = scmp.ne.s32.totalorder %s2563_s22, %s1956_s8 }
 0x5bc   : > { %s2076_s23 = smov [#allocation11]  }
 0x5bd   : > { %p1958_p7 = pnand %p1957_p13, %p1563_p1  ;;  %s1960_s17 = sshll.u32 %s2076_s23, 4  ;;  %s1961_s17 = int_to_ptr.vmem [resolvable:$false] %s1960_s17 }
 0x5be   : > { %s1962_s11 = scalar_lea.vmem %s1961_s17, 1024  ;;  %p1963_p11 = scmp.lt.s32.totalorder %s2563_s22, %s1961_s17 }
 0x5bf   : > { %s2684_s28 = smov %s2683_s13  ;;  %s2568_s29 = scalar_lea.hbm %s2683_s13, %s1564_s16 }
 0x5c0   : > { %p1959_p3 = pneg %p1958_p7  ;;  %p1964_p6 = scmp.lt.s32.totalorder %s1962_s11, %s1956_s8 }
 0x5c2   : > { %p1965_p8 = por %p1964_p6, %p1963_p11 }
 0x5c4   : > { %p1966_p2 = pnand %p1965_p8, %p1959_p3 }
 0x5c6   : > { %1969 = shalt.err (!%p1966_p2)
}
 0x5c7   : > { %s1970_s27 = scalar_lea.hbm %s2568_s29, %s2555_s1  ;;  %s1974_s24 = scalar_lea.hbm %s2684_s28, 1792 }
 0x5c8   : > { %p1971_p9 = scmp.ne.s32.totalorder %s2568_s29, %s1970_s27  ;;  %p1975_p10 = scmp.lt.u32.totalorder %s2568_s29, %s2684_s28 }
 0x5c9   : > { %p1976_p12 = scmp.lt.u32.totalorder %s1974_s24, %s1970_s27  ;;  %p1978_p13 = scmp.lt.u32.totalorder %s1970_s27, %s2568_s29 }
 0x5ca   : > { %p1972_p5 = pnand %p1971_p9, %p1563_p1 }
 0x5cb   : > { %p1977_p0 = por %p1976_p12, %p1975_p10 }
 0x5cc   : > { %p1973_p4 = pneg %p1972_p5 }
 0x5cd   : > { %p1979_p7 = por %p1978_p13, %p1977_p0 }
 0x5cf   : > { %p1980_p3 = pnand %p1979_p7, %p1973_p4 }
 0x5d1   : > { %1983 = shalt.err (!%p1980_p3)
}
 0x5d2   : > { %s2077_s25 = smov 128   ;;  %s2078_s12 = smov 8  }
 0x5d3   : > { %1352 = dma.vmem_to_hbm [thread:$0]  (%p1563_p1), %s2563_s22, %s2555_s1, %s2568_s29, %s1325_s4, %s2077_s25, %s2077_s25, %s2078_s12  }
 0x5d4 PF: > { %s2685_s16 = sld [smem:[#allocation23_spill]]  ;;  %s2686_s26 = sld [smem:[#allocation27_spill]] }
 0x5d5   : > { %p1630_p11 = scmp.ge.s32.totalorder %s2062_s20, 2 }
 0x5da   : > { %s1361_s2 = sand.u32 1, %s2685_s16   ;;  %p2687_p6 = scmp.ne.s32.totalorder %s2686_s26, 0 }
 0x5db   : > { %s1362_s13 = scalar_lea.sflag [#allocation7], %s1361_s2 }
 0x5dc   : > { %p1623_p8 = pnand %p1630_p11, %p2687_p6 }
 0x5de   : > { %2029 = dma.done.wait (!%p1623_p8), %s1362_s13, 512  }
 0x5df   : > { %2031 = vsyncadd (!%p1623_p8), %s1362_s13, 4294966784  ;;  %s27_s20 = sadd.s32 1, %s2062_s20   ;;  %s2688_s8 = sld [smem:[#allocation28_spill]] }
 0x5e0   : > { %p24_p2 = scmp.ge.s32.totalorder %s27_s20, 6   ;;  %s2689_s30 = sld [smem:[#allocation24_spill]] }
 0x5e1   : > { %s2690_s4 = sld [smem:[#allocation25_spill]]  ;;  %s2691_s13 = smov %s2038_s14 }
 0x5e2   : > { %s2692_s14 = smov %s2042_s15  ;;  %s2694_s16 = smov %s2054_s18 }
 0x5e3   : > { %s2695_s17 = smov %s2058_s19  ;;  %26 = sbr.rel (!%p24_p2) target bundleno = 17 (0x11), region = 130 }
 0x5e5   : > { %s2693_s15 = smov %s2688_s8 }
 0x5e6   : > { %s2696_s18 = smov %s2689_s30 }
 0x5e7   : > { %s2697_s19 = smov %s2690_s4 }
 0x5ea   :  { %1367 = vsyncpa [#allocation6], 1 }
 0x5eb   :  { %1369 = vsyncpa [#allocation6 + $0x1], 1 }
 0x5ec   :  { %1370 = vsyncpa [#allocation9], 1 }
 0x5ed   :  { %1371 = vsyncpa [#allocation7], 1 }
 0x5ee   :  { %1373 = vsyncpa [#allocation7 + $0x1], 1 }
 0x5ef   :  { %1374 = vsyncmov [#allocation4] }
 0x5f2   :  { %s1375_s1 = vpop.sfrf %1374 }
 0x5f3   :  { %p1569_p1 = scmp.ne.s32.totalorder %s1375_s1, 0 }
 0x5f5   :  { %1379 = shalt.err (%p1569_p1)  }
 0x5f6   :  { %1381 = vsyncmov [#allocation4 + $0x1] }
 0x5f9   :  { %s1382_s22 = vpop.sfrf %1381 }
 0x5fa   :  { %p1570_p9 = scmp.ne.s32.totalorder %s1382_s22, 0 }
 0x5fc   :  { %1386 = shalt.err (%p1570_p9)  }

</bundles_post_ra>
